<compile_context>
chip_gen: v7x
topology: tpu7x:2x2x1
jax: 0.10.0
libtpu: 0.0.40
codegen_flags: <defaults>
</compile_context>

<pallas_src>
import functools

import jax
import jax.numpy as jnp
from jax.experimental import pallas as pl
from jax.experimental.pallas import tpu as pltpu


# ------------------------------------------------------------------ kernel

def convnet_kernel(x_ref, wf_ref, bf_ref, wb_ref, bgb_ref, wl_ref, bl_ref,
                   o_ref, *, K, n_stacks, n_blocks):
    """Fused ConvNet forward, whole batch in one invocation.

    x_ref:   (B, Cin, T)       input, PyTorch NCT layout
    wf_ref:  (K*Cin, H)  bf16  first_layer conv weight (tap-major rows)
    bf_ref:  (1, H)      f32
    wb_ref:  (NB, K*H, H) bf16 stacked ConvBlock conv weights, NB = n_stacks*n_blocks
    bgb_ref: (NB, 3, H)  f32   per block: [conv bias, LN gamma, LN beta]
    wl_ref:  (K*H, Cout) bf16  last_layer conv weight
    bl_ref:  (1, Cout)   f32
    o_ref:   (B, Cout, T)      output, PyTorch NCT layout
    """
    B, Cin, T = x_ref.shape
    BT = B * T
    pad = (K - 1) // 2

    # Fold the batch: (B, Cin, T) -> (B*T, Cin); time on sublanes, channels on
    # lanes.  Tiny per-batch 2-D transposes on VMEM-resident data.
    x = jnp.concatenate([x_ref[b].T for b in range(B)],
                        axis=0).astype(jnp.float32)

    # Within-batch row index (0..T-1 tiled B times), hoisted once.  Used to
    # zero the rolled-tap rows that correspond to the conv's zero padding and
    # to rows that would otherwise leak across batch boundaries.
    row_t = jax.lax.broadcasted_iota(jnp.int32, (T, 1), 0)
    row = jnp.concatenate([row_t] * B, axis=0)               # (BT, 1)
    tap_valid = []
    for k in range(K):
        shift = pad - k
        if shift == 0:
            tap_valid.append(None)
        elif shift > 0:
            tap_valid.append(row >= shift)                    # left edge zeros
        else:
            tap_valid.append(row < T + shift)                 # right edge zeros

    def conv(xin, w2d, b_row):
        """'same' Conv1d as a single MXU matmul: (BT, K*C) @ (K*C, Cout).

        xin:   (BT, C) f32
        w2d:   (K*C, Cout) bf16 (tap-major rows: row k*C + c == w[o, c, k])
        b_row: (1, Cout) f32
        """
        taps = []
        for k in range(K):
            shift = pad - k                                   # tap_k[t] = x[t - shift]
            if shift == 0:
                taps.append(xin)
            else:
                rolled = pltpu.roll(xin, shift % BT, axis=0)  # XLU, static shift
                taps.append(jnp.where(tap_valid[k], rolled, 0.0))
        xt = jnp.concatenate(taps, axis=-1).astype(jnp.bfloat16)
        y = jnp.dot(xt, w2d, preferred_element_type=jnp.float32)
        return y + b_row

    # --- first_layer: Conv1d(in_channels -> hidden_size) ---------------------
    h = conv(x, wf_ref[...], bf_ref[...])                     # (BT, H) f32

    # --- ResidualBlockStack ---------------------------------------------------
    for s in range(n_stacks):
        def block_body(j, r):
            # ConvBlock: ReLU -> Dropout(identity, eval) -> Conv1d -> LayerNorm
            idx = s * n_blocks + j
            blk = bgb_ref[idx]                                # (3, H): bias, gamma, beta
            act = jnp.maximum(r, 0.0)
            y = conv(act, wb_ref[idx], blk[0:1, :])
            mean = jnp.mean(y, axis=-1, keepdims=True)
            var = jnp.mean(y * y, axis=-1, keepdims=True) - mean * mean
            return (y - mean) * jax.lax.rsqrt(var + 1e-5) * blk[1:2, :] + blk[2:3, :]

        r = jax.lax.fori_loop(0, n_blocks, block_body, h, unroll=True)
        h = h + r                                             # residual add per stack

    # --- last_layer: Conv1d(hidden_size -> out_channels) ----------------------
    out = conv(h, wl_ref[...], bl_ref[...])                   # (BT, Cout) f32

    # Unfold batch and store in NCT layout.
    for b in range(B):
        o_ref[b] = out[b * T:(b + 1) * T, :].T.astype(o_ref.dtype)


# ------------------------------------------------------------------ wrapper

def pack_params(raw):
    """PyTorch-layout params (Conv1d weight (Cout, Cin, K)) -> kernel layout:
    tap-major 2-D conv weights (K*Cin, Cout) in bf16, blocks stacked, and the
    per-block bias/gamma/beta packed into one (NB, 3, H) f32 tensor."""
    def conv_w(w_oik):
        cout, cin, k = w_oik.shape
        # row index k*Cin + c holds w[o, c, k]
        return (jnp.transpose(w_oik, (2, 1, 0))
                .reshape(k * cin, cout).astype(jnp.bfloat16))

    H = raw["first_b"].shape[0]
    blocks = [p for stack in raw["blocks"] for p in stack]
    return {
        "wf": conv_w(raw["first_w"]),                              # (K*Cin, H) bf16
        "bf": raw["first_b"].reshape(1, H).astype(jnp.float32),
        "wb": jnp.stack([conv_w(p["w"]) for p in blocks]),         # (NB, K*H, H) bf16
        "bgb": jnp.stack([jnp.stack([p["b"], p["gamma"], p["beta"]])
                          for p in blocks]).astype(jnp.float32),   # (NB, 3, H)
        "wl": conv_w(raw["last_w"]),                               # (K*H, Cout) bf16
        "bl": raw["last_b"].reshape(1, -1).astype(jnp.float32),
    }


@functools.partial(jax.jit,
                   static_argnames=("n_stacks", "n_blocks", "kernel_size"))
def convnet_forward(x_bct, params, *, n_stacks, n_blocks, kernel_size):
    """Full ConvNet forward.  x_bct: (B, in_channels, T) — PyTorch NCT layout.
    Returns (B, out_channels, T).  No wrapper-side transposes."""
    B, Cin, T = x_bct.shape
    Cout = params["bl"].shape[-1]
    NB = params["wb"].shape[0]
    assert NB == n_stacks * n_blocks
    assert kernel_size % 2 == 1 and T > (kernel_size - 1) // 2

    kernel = functools.partial(convnet_kernel, K=kernel_size,
                               n_stacks=n_stacks, n_blocks=n_blocks)
    vmem = pl.BlockSpec(memory_space=pltpu.MemorySpace.VMEM)

    return pl.pallas_call(
        kernel,
        out_shape=jax.ShapeDtypeStruct((B, Cout, T), x_bct.dtype),
        in_specs=[vmem] * 7,
        out_specs=vmem,
    )(x_bct, params["wf"], params["bf"], params["wb"], params["bgb"],
      params["wl"], params["bl"])


# ------------------------------------------------------------------ reference
# Mirrors the PyTorch module; conv operands are cast to bf16 (accumulating in
# f32) to match the kernel's MXU numerics, so the comparison tolerance can
# stay tight.  Everything else (LayerNorm, residuals) is f32.

def _conv1d_ref(x_bdt, w_oik, bias, pad):
    y = jax.lax.conv_general_dilated(
        x_bdt.astype(jnp.bfloat16), w_oik.astype(jnp.bfloat16),
        window_strides=(1,), padding=[(pad, pad)],
        dimension_numbers=("NCH", "OIH", "NCH"),
        preferred_element_type=jnp.float32)
    return y + bias[None, :, None]


def convnet_ref(x_bct, raw, n_stacks, n_blocks, K):
    pad = (K - 1) // 2
    h = _conv1d_ref(x_bct, raw["first_w"], raw["first_b"], pad)
    for s in range(n_stacks):
        r = h
        for b in range(n_blocks):
            p = raw["blocks"][s][b]
            a = jnp.maximum(r, 0.0)                       # activation (ReLU)
            c = _conv1d_ref(a, p["w"], p["b"], pad)       # conv
            ct = jnp.transpose(c, (0, 2, 1))              # B T D
            mean = ct.mean(-1, keepdims=True)
            var = ((ct - mean) ** 2).mean(-1, keepdims=True)
            cn = (ct - mean) / jnp.sqrt(var + 1e-5) * p["gamma"] + p["beta"]
            r = jnp.transpose(cn, (0, 2, 1))              # B D T
        h = h + r
    return _conv1d_ref(h, raw["last_w"], raw["last_b"], pad)


# ------------------------------------------------------------------ main

if __name__ == "__main__":
    # Module hyper-params (small, consistent with ConvNet.__init__)
    B, T = 2, 16
    in_channels, out_channels = 4, 4
    hidden_size = 32
    n_stacks, n_blocks = 2, 2
    kernel_size = 3
    # activation = "ReLU"; last_layer_avg_pooling = False

    key = jax.random.PRNGKey(0)
    keys = jax.random.split(key, 3 + 2 * n_stacks * n_blocks)

    def rand_conv_w(k, cout, cin, ksz):
        return 0.1 * jax.random.normal(k, (cout, cin, ksz), jnp.float32)

    # PyTorch-layout ("raw") parameters: Conv1d weight (Cout, Cin, K)
    raw = {
        "first_w": rand_conv_w(keys[0], hidden_size, in_channels, kernel_size),
        "first_b": 0.1 * jax.random.normal(keys[1], (hidden_size,), jnp.float32),
        "last_w": rand_conv_w(keys[2], out_channels, hidden_size, kernel_size),
        "last_b": jnp.zeros((out_channels,), jnp.float32),
        "blocks": [],
    }
    ki = 3
    for s in range(n_stacks):
        stack_params = []
        for b in range(n_blocks):
            stack_params.append({
                "w": rand_conv_w(keys[ki], hidden_size, hidden_size, kernel_size),
                "b": 0.1 * jax.random.normal(keys[ki + 1], (hidden_size,),
                                             jnp.float32),
                "gamma": jnp.ones((hidden_size,), jnp.float32),   # LayerNorm init
                "beta": jnp.zeros((hidden_size,), jnp.float32),
            })
            ki += 2
        raw["blocks"].append(stack_params)

    params = pack_params(raw)

    # Input in PyTorch NCT layout: (B, in_channels, T)
    x = jax.random.normal(jax.random.PRNGKey(42), (B, in_channels, T),
                          jnp.float32)

    out = convnet_forward(x, params, n_stacks=n_stacks, n_blocks=n_blocks,
                          kernel_size=kernel_size)
    out = jax.block_until_ready(out)
    assert out.shape == (B, out_channels, T), out.shape

    ref = jax.block_until_ready(
        convnet_ref(x, raw, n_stacks, n_blocks, kernel_size))
    assert jnp.allclose(out, ref, atol=2e-2, rtol=2e-2), (
        float(jnp.max(jnp.abs(out - ref))))

    print("KERNEL_OK")
</pallas_src>

<mosaic_0001>
module attributes {stable_mosaic.version = 11 : i64} {
  func.func @convnet_kernel(%arg0: memref<2x4x16xf32, #tpu.memory_space<vmem>>, %arg1: memref<12x32xbf16, #tpu.memory_space<vmem>>, %arg2: memref<1x32xf32, #tpu.memory_space<vmem>>, %arg3: memref<4x96x32xbf16, #tpu.memory_space<vmem>>, %arg4: memref<4x3x32xf32, #tpu.memory_space<vmem>>, %arg5: memref<96x4xbf16, #tpu.memory_space<vmem>>, %arg6: memref<1x4xf32, #tpu.memory_space<vmem>>, %arg7: memref<2x4x16xf32, #tpu.memory_space<vmem>>) attributes {dimension_semantics = [], scalar_prefetch = 0 : i64, scratch_operands = 0 : i64, tpu.core_type = #tpu.core_type<tc>} {
    %c0 = arith.constant 0 : index
    %c0_0 = arith.constant 0 : index
    %c0_1 = arith.constant 0 : index
    %0 = vector.load %arg0[%c0, %c0_0, %c0_1] : memref<2x4x16xf32, #tpu.memory_space<vmem>>, vector<1x4x16xf32>
    %1 = vector.shape_cast %0 : vector<1x4x16xf32> to vector<4x16xf32>
    %2 = tpu.transpose %1, [1, 0] : vector<4x16xf32> -> vector<16x4xf32>
    %c1 = arith.constant 1 : index
    %c0_2 = arith.constant 0 : index
    %c0_3 = arith.constant 0 : index
    %3 = vector.load %arg0[%c1, %c0_2, %c0_3] : memref<2x4x16xf32, #tpu.memory_space<vmem>>, vector<1x4x16xf32>
    %4 = vector.shape_cast %3 : vector<1x4x16xf32> to vector<4x16xf32>
    %5 = tpu.transpose %4, [1, 0] : vector<4x16xf32> -> vector<16x4xf32>
    %6 = tpu.concatenate %2, %5 in 0 : vector<16x4xf32>, vector<16x4xf32> -> vector<32x4xf32>
    %7 = tpu.iota {dimensions = array<i32: 0>} : vector<16x1xi32>
    %8 = tpu.concatenate %7, %7 in 0 : vector<16x1xi32>, vector<16x1xi32> -> vector<32x1xi32>
    %c1_i32 = arith.constant 1 : i32
    %9 = vector.broadcast %c1_i32 : i32 to vector<32x1xi32>
    %10 = arith.cmpi sge, %8, %9 : vector<32x1xi32>
    %c15_i32 = arith.constant 15 : i32
    %11 = vector.broadcast %c15_i32 : i32 to vector<32x1xi32>
    %12 = arith.cmpi slt, %8, %11 : vector<32x1xi32>
    %c0_4 = arith.constant 0 : index
    %c0_5 = arith.constant 0 : index
    %13 = vector.load %arg1[%c0_4, %c0_5] : memref<12x32xbf16, #tpu.memory_space<vmem>>, vector<12x32xbf16>
    %c0_6 = arith.constant 0 : index
    %c0_7 = arith.constant 0 : index
    %14 = vector.load %arg2[%c0_6, %c0_7] : memref<1x32xf32, #tpu.memory_space<vmem>>, vector<1x32xf32>
    %c1_i32_8 = arith.constant 1 : i32
    %15 = tpu.dynamic_rotate %6 by %c1_i32_8 dim 0 : vector<32x4xf32>, i32 -> vector<32x4xf32>
    %cst = arith.constant 0.000000e+00 : f32
    %16 = vector.shape_cast %10 : vector<32x1xi1> to vector<32x1xi1>
    %17 = vector.broadcast %16 : vector<32x1xi1> to vector<32x4xi1>
    %18 = vector.broadcast %cst : f32 to vector<32x4xf32>
    %19 = arith.select %17, %15, %18 : vector<32x4xi1>, vector<32x4xf32>
    %c31_i32 = arith.constant 31 : i32
    %20 = tpu.dynamic_rotate %6 by %c31_i32 dim 0 : vector<32x4xf32>, i32 -> vector<32x4xf32>
    %cst_9 = arith.constant 0.000000e+00 : f32
    %21 = vector.shape_cast %12 : vector<32x1xi1> to vector<32x1xi1>
    %22 = vector.broadcast %21 : vector<32x1xi1> to vector<32x4xi1>
    %23 = vector.broadcast %cst_9 : f32 to vector<32x4xf32>
    %24 = arith.select %22, %20, %23 : vector<32x4xi1>, vector<32x4xf32>
    %25 = tpu.concatenate %19, %6, %24 in 1 : vector<32x4xf32>, vector<32x4xf32>, vector<32x4xf32> -> vector<32x12xf32>
    %26 = arith.truncf %25 : vector<32x12xf32> to vector<32x12xbf16>
    %cst_10 = arith.constant dense<0.000000e+00> : vector<32x32xf32>
    %27 = tpu.matmul %26, %13, %cst_10 {dimension_numbers = #tpu.dot_dimension_numbers<[1], [0], [0], [1], [0, 0, 1, 1], [], []>} : vector<32x12xbf16>, vector<12x32xbf16>, vector<32x32xf32> -> vector<32x32xf32>
    %28 = vector.broadcast %14 : vector<1x32xf32> to vector<32x32xf32>
    %29 = arith.addf %27, %28 : vector<32x32xf32>
    %c0_i32 = arith.constant 0 : i32
    %c0_i32_11 = arith.constant 0 : i32
    %30 = arith.addi %c0_i32_11, %c0_i32 : i32
    %31 = arith.index_cast %30 : i32 to index
    %c0_12 = arith.constant 0 : index
    %c0_13 = arith.constant 0 : index
    %32 = vector.load %arg4[%31, %c0_12, %c0_13] : memref<4x3x32xf32, #tpu.memory_space<vmem>>, vector<1x3x32xf32>
    %33 = vector.shape_cast %32 : vector<1x3x32xf32> to vector<3x32xf32>
    %cst_14 = arith.constant 0.000000e+00 : f32
    %34 = vector.broadcast %cst_14 : f32 to vector<32x32xf32>
    %35 = arith.maximumf %29, %34 : vector<32x32xf32>
    %36 = arith.index_cast %30 : i32 to index
    %c0_15 = arith.constant 0 : index
    %c0_16 = arith.constant 0 : index
    %37 = vector.load %arg3[%36, %c0_15, %c0_16] : memref<4x96x32xbf16, #tpu.memory_space<vmem>>, vector<1x96x32xbf16>
    %38 = vector.shape_cast %37 : vector<1x96x32xbf16> to vector<96x32xbf16>
    %39 = vector.extract_strided_slice %33 {offsets = [0, 0], sizes = [1, 32], strides = [1, 1]} : vector<3x32xf32> to vector<1x32xf32>
    %c1_i32_17 = arith.constant 1 : i32
    %40 = tpu.dynamic_rotate %35 by %c1_i32_17 dim 0 : vector<32x32xf32>, i32 -> vector<32x32xf32>
    %cst_18 = arith.constant 0.000000e+00 : f32
    %41 = vector.shape_cast %10 : vector<32x1xi1> to vector<32x1xi1>
    %42 = vector.broadcast %41 : vector<32x1xi1> to vector<32x32xi1>
    %43 = vector.broadcast %cst_18 : f32 to vector<32x32xf32>
    %44 = arith.select %42, %40, %43 : vector<32x32xi1>, vector<32x32xf32>
    %c31_i32_19 = arith.constant 31 : i32
    %45 = tpu.dynamic_rotate %35 by %c31_i32_19 dim 0 : vector<32x32xf32>, i32 -> vector<32x32xf32>
    %cst_20 = arith.constant 0.000000e+00 : f32
    %46 = vector.shape_cast %12 : vector<32x1xi1> to vector<32x1xi1>
    %47 = vector.broadcast %46 : vector<32x1xi1> to vector<32x32xi1>
    %48 = vector.broadcast %cst_20 : f32 to vector<32x32xf32>
    %49 = arith.select %47, %45, %48 : vector<32x32xi1>, vector<32x32xf32>
    %50 = tpu.concatenate %44, %35, %49 in 1 : vector<32x32xf32>, vector<32x32xf32>, vector<32x32xf32> -> vector<32x96xf32>
    %51 = arith.truncf %50 : vector<32x96xf32> to vector<32x96xbf16>
    %cst_21 = arith.constant dense<0.000000e+00> : vector<32x32xf32>
    %52 = tpu.matmul %51, %38, %cst_21 {dimension_numbers = #tpu.dot_dimension_numbers<[1], [0], [0], [1], [0, 0, 1, 1], [], []>} : vector<32x96xbf16>, vector<96x32xbf16>, vector<32x32xf32> -> vector<32x32xf32>
    %53 = vector.broadcast %39 : vector<1x32xf32> to vector<32x32xf32>
    %54 = arith.addf %52, %53 : vector<32x32xf32>
    %cst_22 = arith.constant dense<0.000000e+00> : vector<32xf32>
    %55 = vector.multi_reduction <add>, %54, %cst_22 [1] : vector<32x32xf32> to vector<32xf32>
    %56 = vector.shape_cast %55 : vector<32xf32> to vector<32x1xf32>
    %cst_23 = arith.constant 3.200000e+01 : f32
    %57 = vector.broadcast %cst_23 : f32 to vector<32x1xf32>
    %58 = arith.divf %56, %57 : vector<32x1xf32>
    %59 = arith.mulf %54, %54 : vector<32x32xf32>
    %cst_24 = arith.constant dense<0.000000e+00> : vector<32xf32>
    %60 = vector.multi_reduction <add>, %59, %cst_24 [1] : vector<32x32xf32> to vector<32xf32>
    %61 = vector.shape_cast %60 : vector<32xf32> to vector<32x1xf32>
    %cst_25 = arith.constant 3.200000e+01 : f32
    %62 = vector.broadcast %cst_25 : f32 to vector<32x1xf32>
    %63 = arith.divf %61, %62 : vector<32x1xf32>
    %64 = arith.mulf %58, %58 : vector<32x1xf32>
    %65 = arith.subf %63, %64 : vector<32x1xf32>
    %66 = vector.broadcast %58 : vector<32x1xf32> to vector<32x32xf32>
    %67 = arith.subf %54, %66 : vector<32x32xf32>
    %cst_26 = arith.constant 9.99999974E-6 : f32
    %68 = vector.broadcast %cst_26 : f32 to vector<32x1xf32>
    %69 = arith.addf %65, %68 : vector<32x1xf32>
    %70 = math.rsqrt %69 : vector<32x1xf32>
    %71 = vector.broadcast %70 : vector<32x1xf32> to vector<32x32xf32>
    %72 = arith.mulf %67, %71 : vector<32x32xf32>
    %73 = vector.extract_strided_slice %33 {offsets = [1, 0], sizes = [1, 32], strides = [1, 1]} : vector<3x32xf32> to vector<1x32xf32>
    %74 = vector.broadcast %73 : vector<1x32xf32> to vector<32x32xf32>
    %75 = arith.mulf %72, %74 : vector<32x32xf32>
    %76 = vector.extract_strided_slice %33 {offsets = [2, 0], sizes = [1, 32], strides = [1, 1]} : vector<3x32xf32> to vector<1x32xf32>
    %77 = vector.broadcast %76 : vector<1x32xf32> to vector<32x32xf32>
    %78 = arith.addf %75, %77 : vector<32x32xf32>
    %c1_i32_27 = arith.constant 1 : i32
    %c0_i32_28 = arith.constant 0 : i32
    %79 = arith.addi %c0_i32_28, %c1_i32_27 : i32
    %80 = arith.index_cast %79 : i32 to index
    %c0_29 = arith.constant 0 : index
    %c0_30 = arith.constant 0 : index
    %81 = vector.load %arg4[%80, %c0_29, %c0_30] : memref<4x3x32xf32, #tpu.memory_space<vmem>>, vector<1x3x32xf32>
    %82 = vector.shape_cast %81 : vector<1x3x32xf32> to vector<3x32xf32>
    %cst_31 = arith.constant 0.000000e+00 : f32
    %83 = vector.broadcast %cst_31 : f32 to vector<32x32xf32>
    %84 = arith.maximumf %78, %83 : vector<32x32xf32>
    %85 = arith.index_cast %79 : i32 to index
    %c0_32 = arith.constant 0 : index
    %c0_33 = arith.constant 0 : index
    %86 = vector.load %arg3[%85, %c0_32, %c0_33] : memref<4x96x32xbf16, #tpu.memory_space<vmem>>, vector<1x96x32xbf16>
    %87 = vector.shape_cast %86 : vector<1x96x32xbf16> to vector<96x32xbf16>
    %88 = vector.extract_strided_slice %82 {offsets = [0, 0], sizes = [1, 32], strides = [1, 1]} : vector<3x32xf32> to vector<1x32xf32>
    %c1_i32_34 = arith.constant 1 : i32
    %89 = tpu.dynamic_rotate %84 by %c1_i32_34 dim 0 : vector<32x32xf32>, i32 -> vector<32x32xf32>
    %cst_35 = arith.constant 0.000000e+00 : f32
    %90 = vector.shape_cast %10 : vector<32x1xi1> to vector<32x1xi1>
    %91 = vector.broadcast %90 : vector<32x1xi1> to vector<32x32xi1>
    %92 = vector.broadcast %cst_35 : f32 to vector<32x32xf32>
    %93 = arith.select %91, %89, %92 : vector<32x32xi1>, vector<32x32xf32>
    %c31_i32_36 = arith.constant 31 : i32
    %94 = tpu.dynamic_rotate %84 by %c31_i32_36 dim 0 : vector<32x32xf32>, i32 -> vector<32x32xf32>
    %cst_37 = arith.constant 0.000000e+00 : f32
    %95 = vector.shape_cast %12 : vector<32x1xi1> to vector<32x1xi1>
    %96 = vector.broadcast %95 : vector<32x1xi1> to vector<32x32xi1>
    %97 = vector.broadcast %cst_37 : f32 to vector<32x32xf32>
    %98 = arith.select %96, %94, %97 : vector<32x32xi1>, vector<32x32xf32>
    %99 = tpu.concatenate %93, %84, %98 in 1 : vector<32x32xf32>, vector<32x32xf32>, vector<32x32xf32> -> vector<32x96xf32>
    %100 = arith.truncf %99 : vector<32x96xf32> to vector<32x96xbf16>
    %cst_38 = arith.constant dense<0.000000e+00> : vector<32x32xf32>
    %101 = tpu.matmul %100, %87, %cst_38 {dimension_numbers = #tpu.dot_dimension_numbers<[1], [0], [0], [1], [0, 0, 1, 1], [], []>} : vector<32x96xbf16>, vector<96x32xbf16>, vector<32x32xf32> -> vector<32x32xf32>
    %102 = vector.broadcast %88 : vector<1x32xf32> to vector<32x32xf32>
    %103 = arith.addf %101, %102 : vector<32x32xf32>
    %cst_39 = arith.constant dense<0.000000e+00> : vector<32xf32>
    %104 = vector.multi_reduction <add>, %103, %cst_39 [1] : vector<32x32xf32> to vector<32xf32>
    %105 = vector.shape_cast %104 : vector<32xf32> to vector<32x1xf32>
    %cst_40 = arith.constant 3.200000e+01 : f32
    %106 = vector.broadcast %cst_40 : f32 to vector<32x1xf32>
    %107 = arith.divf %105, %106 : vector<32x1xf32>
    %108 = arith.mulf %103, %103 : vector<32x32xf32>
    %cst_41 = arith.constant dense<0.000000e+00> : vector<32xf32>
    %109 = vector.multi_reduction <add>, %108, %cst_41 [1] : vector<32x32xf32> to vector<32xf32>
    %110 = vector.shape_cast %109 : vector<32xf32> to vector<32x1xf32>
    %cst_42 = arith.constant 3.200000e+01 : f32
    %111 = vector.broadcast %cst_42 : f32 to vector<32x1xf32>
    %112 = arith.divf %110, %111 : vector<32x1xf32>
    %113 = arith.mulf %107, %107 : vector<32x1xf32>
    %114 = arith.subf %112, %113 : vector<32x1xf32>
    %115 = vector.broadcast %107 : vector<32x1xf32> to vector<32x32xf32>
    %116 = arith.subf %103, %115 : vector<32x32xf32>
    %cst_43 = arith.constant 9.99999974E-6 : f32
    %117 = vector.broadcast %cst_43 : f32 to vector<32x1xf32>
    %118 = arith.addf %114, %117 : vector<32x1xf32>
    %119 = math.rsqrt %118 : vector<32x1xf32>
    %120 = vector.broadcast %119 : vector<32x1xf32> to vector<32x32xf32>
    %121 = arith.mulf %116, %120 : vector<32x32xf32>
    %122 = vector.extract_strided_slice %82 {offsets = [1, 0], sizes = [1, 32], strides = [1, 1]} : vector<3x32xf32> to vector<1x32xf32>
    %123 = vector.broadcast %122 : vector<1x32xf32> to vector<32x32xf32>
    %124 = arith.mulf %121, %123 : vector<32x32xf32>
    %125 = vector.extract_strided_slice %82 {offsets = [2, 0], sizes = [1, 32], strides = [1, 1]} : vector<3x32xf32> to vector<1x32xf32>
    %126 = vector.broadcast %125 : vector<1x32xf32> to vector<32x32xf32>
    %127 = arith.addf %124, %126 : vector<32x32xf32>
    %c2_i32 = arith.constant 2 : i32
    %128 = arith.addf %29, %127 : vector<32x32xf32>
    %c0_i32_44 = arith.constant 0 : i32
    %c2_i32_45 = arith.constant 2 : i32
    %129 = arith.addi %c2_i32_45, %c0_i32_44 : i32
    %130 = arith.index_cast %129 : i32 to index
    %c0_46 = arith.constant 0 : index
    %c0_47 = arith.constant 0 : index
    %131 = vector.load %arg4[%130, %c0_46, %c0_47] : memref<4x3x32xf32, #tpu.memory_space<vmem>>, vector<1x3x32xf32>
    %132 = vector.shape_cast %131 : vector<1x3x32xf32> to vector<3x32xf32>
    %cst_48 = arith.constant 0.000000e+00 : f32
    %133 = vector.broadcast %cst_48 : f32 to vector<32x32xf32>
    %134 = arith.maximumf %128, %133 : vector<32x32xf32>
    %135 = arith.index_cast %129 : i32 to index
    %c0_49 = arith.constant 0 : index
    %c0_50 = arith.constant 0 : index
    %136 = vector.load %arg3[%135, %c0_49, %c0_50] : memref<4x96x32xbf16, #tpu.memory_space<vmem>>, vector<1x96x32xbf16>
    %137 = vector.shape_cast %136 : vector<1x96x32xbf16> to vector<96x32xbf16>
    %138 = vector.extract_strided_slice %132 {offsets = [0, 0], sizes = [1, 32], strides = [1, 1]} : vector<3x32xf32> to vector<1x32xf32>
    %c1_i32_51 = arith.constant 1 : i32
    %139 = tpu.dynamic_rotate %134 by %c1_i32_51 dim 0 : vector<32x32xf32>, i32 -> vector<32x32xf32>
    %cst_52 = arith.constant 0.000000e+00 : f32
    %140 = vector.shape_cast %10 : vector<32x1xi1> to vector<32x1xi1>
    %141 = vector.broadcast %140 : vector<32x1xi1> to vector<32x32xi1>
    %142 = vector.broadcast %cst_52 : f32 to vector<32x32xf32>
    %143 = arith.select %141, %139, %142 : vector<32x32xi1>, vector<32x32xf32>
    %c31_i32_53 = arith.constant 31 : i32
    %144 = tpu.dynamic_rotate %134 by %c31_i32_53 dim 0 : vector<32x32xf32>, i32 -> vector<32x32xf32>
    %cst_54 = arith.constant 0.000000e+00 : f32
    %145 = vector.shape_cast %12 : vector<32x1xi1> to vector<32x1xi1>
    %146 = vector.broadcast %145 : vector<32x1xi1> to vector<32x32xi1>
    %147 = vector.broadcast %cst_54 : f32 to vector<32x32xf32>
    %148 = arith.select %146, %144, %147 : vector<32x32xi1>, vector<32x32xf32>
    %149 = tpu.concatenate %143, %134, %148 in 1 : vector<32x32xf32>, vector<32x32xf32>, vector<32x32xf32> -> vector<32x96xf32>
    %150 = arith.truncf %149 : vector<32x96xf32> to vector<32x96xbf16>
    %cst_55 = arith.constant dense<0.000000e+00> : vector<32x32xf32>
    %151 = tpu.matmul %150, %137, %cst_55 {dimension_numbers = #tpu.dot_dimension_numbers<[1], [0], [0], [1], [0, 0, 1, 1], [], []>} : vector<32x96xbf16>, vector<96x32xbf16>, vector<32x32xf32> -> vector<32x32xf32>
    %152 = vector.broadcast %138 : vector<1x32xf32> to vector<32x32xf32>
    %153 = arith.addf %151, %152 : vector<32x32xf32>
    %cst_56 = arith.constant dense<0.000000e+00> : vector<32xf32>
    %154 = vector.multi_reduction <add>, %153, %cst_56 [1] : vector<32x32xf32> to vector<32xf32>
    %155 = vector.shape_cast %154 : vector<32xf32> to vector<32x1xf32>
    %cst_57 = arith.constant 3.200000e+01 : f32
    %156 = vector.broadcast %cst_57 : f32 to vector<32x1xf32>
    %157 = arith.divf %155, %156 : vector<32x1xf32>
    %158 = arith.mulf %153, %153 : vector<32x32xf32>
    %cst_58 = arith.constant dense<0.000000e+00> : vector<32xf32>
    %159 = vector.multi_reduction <add>, %158, %cst_58 [1] : vector<32x32xf32> to vector<32xf32>
    %160 = vector.shape_cast %159 : vector<32xf32> to vector<32x1xf32>
    %cst_59 = arith.constant 3.200000e+01 : f32
    %161 = vector.broadcast %cst_59 : f32 to vector<32x1xf32>
    %162 = arith.divf %160, %161 : vector<32x1xf32>
    %163 = arith.mulf %157, %157 : vector<32x1xf32>
    %164 = arith.subf %162, %163 : vector<32x1xf32>
    %165 = vector.broadcast %157 : vector<32x1xf32> to vector<32x32xf32>
    %166 = arith.subf %153, %165 : vector<32x32xf32>
    %cst_60 = arith.constant 9.99999974E-6 : f32
    %167 = vector.broadcast %cst_60 : f32 to vector<32x1xf32>
    %168 = arith.addf %164, %167 : vector<32x1xf32>
    %169 = math.rsqrt %168 : vector<32x1xf32>
    %170 = vector.broadcast %169 : vector<32x1xf32> to vector<32x32xf32>
    %171 = arith.mulf %166, %170 : vector<32x32xf32>
    %172 = vector.extract_strided_slice %132 {offsets = [1, 0], sizes = [1, 32], strides = [1, 1]} : vector<3x32xf32> to vector<1x32xf32>
    %173 = vector.broadcast %172 : vector<1x32xf32> to vector<32x32xf32>
    %174 = arith.mulf %171, %173 : vector<32x32xf32>
    %175 = vector.extract_strided_slice %132 {offsets = [2, 0], sizes = [1, 32], strides = [1, 1]} : vector<3x32xf32> to vector<1x32xf32>
    %176 = vector.broadcast %175 : vector<1x32xf32> to vector<32x32xf32>
    %177 = arith.addf %174, %176 : vector<32x32xf32>
    %c1_i32_61 = arith.constant 1 : i32
    %c2_i32_62 = arith.constant 2 : i32
    %178 = arith.addi %c2_i32_62, %c1_i32_61 : i32
    %179 = arith.index_cast %178 : i32 to index
    %c0_63 = arith.constant 0 : index
    %c0_64 = arith.constant 0 : index
    %180 = vector.load %arg4[%179, %c0_63, %c0_64] : memref<4x3x32xf32, #tpu.memory_space<vmem>>, vector<1x3x32xf32>
    %181 = vector.shape_cast %180 : vector<1x3x32xf32> to vector<3x32xf32>
    %cst_65 = arith.constant 0.000000e+00 : f32
    %182 = vector.broadcast %cst_65 : f32 to vector<32x32xf32>
    %183 = arith.maximumf %177, %182 : vector<32x32xf32>
    %184 = arith.index_cast %178 : i32 to index
    %c0_66 = arith.constant 0 : index
    %c0_67 = arith.constant 0 : index
    %185 = vector.load %arg3[%184, %c0_66, %c0_67] : memref<4x96x32xbf16, #tpu.memory_space<vmem>>, vector<1x96x32xbf16>
    %186 = vector.shape_cast %185 : vector<1x96x32xbf16> to vector<96x32xbf16>
    %187 = vector.extract_strided_slice %181 {offsets = [0, 0], sizes = [1, 32], strides = [1, 1]} : vector<3x32xf32> to vector<1x32xf32>
    %c1_i32_68 = arith.constant 1 : i32
    %188 = tpu.dynamic_rotate %183 by %c1_i32_68 dim 0 : vector<32x32xf32>, i32 -> vector<32x32xf32>
    %cst_69 = arith.constant 0.000000e+00 : f32
    %189 = vector.shape_cast %10 : vector<32x1xi1> to vector<32x1xi1>
    %190 = vector.broadcast %189 : vector<32x1xi1> to vector<32x32xi1>
    %191 = vector.broadcast %cst_69 : f32 to vector<32x32xf32>
    %192 = arith.select %190, %188, %191 : vector<32x32xi1>, vector<32x32xf32>
    %c31_i32_70 = arith.constant 31 : i32
    %193 = tpu.dynamic_rotate %183 by %c31_i32_70 dim 0 : vector<32x32xf32>, i32 -> vector<32x32xf32>
    %cst_71 = arith.constant 0.000000e+00 : f32
    %194 = vector.shape_cast %12 : vector<32x1xi1> to vector<32x1xi1>
    %195 = vector.broadcast %194 : vector<32x1xi1> to vector<32x32xi1>
    %196 = vector.broadcast %cst_71 : f32 to vector<32x32xf32>
    %197 = arith.select %195, %193, %196 : vector<32x32xi1>, vector<32x32xf32>
    %198 = tpu.concatenate %192, %183, %197 in 1 : vector<32x32xf32>, vector<32x32xf32>, vector<32x32xf32> -> vector<32x96xf32>
    %199 = arith.truncf %198 : vector<32x96xf32> to vector<32x96xbf16>
    %cst_72 = arith.constant dense<0.000000e+00> : vector<32x32xf32>
    %200 = tpu.matmul %199, %186, %cst_72 {dimension_numbers = #tpu.dot_dimension_numbers<[1], [0], [0], [1], [0, 0, 1, 1], [], []>} : vector<32x96xbf16>, vector<96x32xbf16>, vector<32x32xf32> -> vector<32x32xf32>
    %201 = vector.broadcast %187 : vector<1x32xf32> to vector<32x32xf32>
    %202 = arith.addf %200, %201 : vector<32x32xf32>
    %cst_73 = arith.constant dense<0.000000e+00> : vector<32xf32>
    %203 = vector.multi_reduction <add>, %202, %cst_73 [1] : vector<32x32xf32> to vector<32xf32>
    %204 = vector.shape_cast %203 : vector<32xf32> to vector<32x1xf32>
    %cst_74 = arith.constant 3.200000e+01 : f32
    %205 = vector.broadcast %cst_74 : f32 to vector<32x1xf32>
    %206 = arith.divf %204, %205 : vector<32x1xf32>
    %207 = arith.mulf %202, %202 : vector<32x32xf32>
    %cst_75 = arith.constant dense<0.000000e+00> : vector<32xf32>
    %208 = vector.multi_reduction <add>, %207, %cst_75 [1] : vector<32x32xf32> to vector<32xf32>
    %209 = vector.shape_cast %208 : vector<32xf32> to vector<32x1xf32>
    %cst_76 = arith.constant 3.200000e+01 : f32
    %210 = vector.broadcast %cst_76 : f32 to vector<32x1xf32>
    %211 = arith.divf %209, %210 : vector<32x1xf32>
    %212 = arith.mulf %206, %206 : vector<32x1xf32>
    %213 = arith.subf %211, %212 : vector<32x1xf32>
    %214 = vector.broadcast %206 : vector<32x1xf32> to vector<32x32xf32>
    %215 = arith.subf %202, %214 : vector<32x32xf32>
    %cst_77 = arith.constant 9.99999974E-6 : f32
    %216 = vector.broadcast %cst_77 : f32 to vector<32x1xf32>
    %217 = arith.addf %213, %216 : vector<32x1xf32>
    %218 = math.rsqrt %217 : vector<32x1xf32>
    %219 = vector.broadcast %218 : vector<32x1xf32> to vector<32x32xf32>
    %220 = arith.mulf %215, %219 : vector<32x32xf32>
    %221 = vector.extract_strided_slice %181 {offsets = [1, 0], sizes = [1, 32], strides = [1, 1]} : vector<3x32xf32> to vector<1x32xf32>
    %222 = vector.broadcast %221 : vector<1x32xf32> to vector<32x32xf32>
    %223 = arith.mulf %220, %222 : vector<32x32xf32>
    %224 = vector.extract_strided_slice %181 {offsets = [2, 0], sizes = [1, 32], strides = [1, 1]} : vector<3x32xf32> to vector<1x32xf32>
    %225 = vector.broadcast %224 : vector<1x32xf32> to vector<32x32xf32>
    %226 = arith.addf %223, %225 : vector<32x32xf32>
    %c2_i32_78 = arith.constant 2 : i32
    %227 = arith.addf %128, %226 : vector<32x32xf32>
    %c0_79 = arith.constant 0 : index
    %c0_80 = arith.constant 0 : index
    %228 = vector.load %arg5[%c0_79, %c0_80] : memref<96x4xbf16, #tpu.memory_space<vmem>>, vector<96x4xbf16>
    %c0_81 = arith.constant 0 : index
    %c0_82 = arith.constant 0 : index
    %229 = vector.load %arg6[%c0_81, %c0_82] : memref<1x4xf32, #tpu.memory_space<vmem>>, vector<1x4xf32>
    %c1_i32_83 = arith.constant 1 : i32
    %230 = tpu.dynamic_rotate %227 by %c1_i32_83 dim 0 : vector<32x32xf32>, i32 -> vector<32x32xf32>
    %cst_84 = arith.constant 0.000000e+00 : f32
    %231 = vector.shape_cast %10 : vector<32x1xi1> to vector<32x1xi1>
    %232 = vector.broadcast %231 : vector<32x1xi1> to vector<32x32xi1>
    %233 = vector.broadcast %cst_84 : f32 to vector<32x32xf32>
    %234 = arith.select %232, %230, %233 : vector<32x32xi1>, vector<32x32xf32>
    %c31_i32_85 = arith.constant 31 : i32
    %235 = tpu.dynamic_rotate %227 by %c31_i32_85 dim 0 : vector<32x32xf32>, i32 -> vector<32x32xf32>
    %cst_86 = arith.constant 0.000000e+00 : f32
    %236 = vector.shape_cast %12 : vector<32x1xi1> to vector<32x1xi1>
    %237 = vector.broadcast %236 : vector<32x1xi1> to vector<32x32xi1>
    %238 = vector.broadcast %cst_86 : f32 to vector<32x32xf32>
    %239 = arith.select %237, %235, %238 : vector<32x32xi1>, vector<32x32xf32>
    %240 = tpu.concatenate %234, %227, %239 in 1 : vector<32x32xf32>, vector<32x32xf32>, vector<32x32xf32> -> vector<32x96xf32>
    %241 = arith.truncf %240 : vector<32x96xf32> to vector<32x96xbf16>
    %cst_87 = arith.constant dense<0.000000e+00> : vector<32x4xf32>
    %242 = tpu.matmul %241, %228, %cst_87 {dimension_numbers = #tpu.dot_dimension_numbers<[1], [0], [0], [1], [0, 0, 1, 1], [], []>} : vector<32x96xbf16>, vector<96x4xbf16>, vector<32x4xf32> -> vector<32x4xf32>
    %243 = vector.broadcast %229 : vector<1x4xf32> to vector<32x4xf32>
    %244 = arith.addf %242, %243 : vector<32x4xf32>
    %245 = vector.extract_strided_slice %244 {offsets = [0, 0], sizes = [16, 4], strides = [1, 1]} : vector<32x4xf32> to vector<16x4xf32>
    %246 = tpu.transpose %245, [1, 0] : vector<16x4xf32> -> vector<4x16xf32>
    %c0_88 = arith.constant 0 : index
    %c0_89 = arith.constant 0 : index
    %c0_90 = arith.constant 0 : index
    %247 = vector.load %arg7[%c0_88, %c0_89, %c0_90] : memref<2x4x16xf32, #tpu.memory_space<vmem>>, vector<1x4x16xf32>
    %248 = vector.shape_cast %247 : vector<1x4x16xf32> to vector<4x16xf32>
    %249 = vector.shape_cast %246 : vector<4x16xf32> to vector<1x4x16xf32>
    tpu.vector_store %arg7[%c0_88, %c0_89, %c0_90], %249 {strides = array<i32>} : memref<2x4x16xf32, #tpu.memory_space<vmem>>, vector<1x4x16xf32>,
    %250 = vector.extract_strided_slice %244 {offsets = [16, 0], sizes = [16, 4], strides = [1, 1]} : vector<32x4xf32> to vector<16x4xf32>
    %251 = tpu.transpose %250, [1, 0] : vector<16x4xf32> -> vector<4x16xf32>
    %c1_91 = arith.constant 1 : index
    %c0_92 = arith.constant 0 : index
    %c0_93 = arith.constant 0 : index
    %252 = vector.load %arg7[%c1_91, %c0_92, %c0_93] : memref<2x4x16xf32, #tpu.memory_space<vmem>>, vector<1x4x16xf32>
    %253 = vector.shape_cast %252 : vector<1x4x16xf32> to vector<4x16xf32>
    %254 = vector.shape_cast %251 : vector<4x16xf32> to vector<1x4x16xf32>
    tpu.vector_store %arg7[%c1_91, %c0_92, %c0_93], %254 {strides = array<i32>} : memref<2x4x16xf32, #tpu.memory_space<vmem>>, vector<1x4x16xf32>,
    return
  }
}

</mosaic_0001>

<bundles_post_ra>
// kernel: convnet_forward.1
= control target key start
LH: loop header
LB: loop body
LE: loop exit
PB: predicated region body
PF: predicated region fallthrough
CT: control target
= control target key end

     0   :  { %v95_v2 = vlaneseq  ;;  %v2004_v3 = vmov 0   ;;  %v2005_v5 = vmov 1   ;;  %s2674_s0 = inlined_call_operand.vmem [shape: f32[2,4,16], index: 0, kind: input, shape index: {}]   ;;  %s2675_s1 = inlined_call_operand.vmem [shape: bf16[12,32], index: 1, kind: input, shape index: {}]   ;;  %s2676_s2 = inlined_call_operand.vmem [shape: f32[1,32], index: 2, kind: input, shape index: {}]   ;;  %s2677_s3 = inlined_call_operand.vmem [shape: bf16[4,96,32], index: 3, kind: input, shape index: {}]   ;;  %s2678_s4 = inlined_call_operand.vmem [shape: f32[4,3,32], index: 4, kind: input, shape index: {}]   ;;  %s2679_s5 = inlined_call_operand.vmem [shape: bf16[96,4], index: 5, kind: input, shape index: {}]   ;;  %s2680_s6 = inlined_call_operand.vmem [shape: f32[1,4], index: 6, kind: input, shape index: {}]   ;;  %s2681_s7 = inlined_call_operand.hbm [shape: f32[2,4,16], index: 7, kind: output, shape index: {}]  }
   0x1   :  { %v28_v0 = vld [vmem:[%s2674_s0] sm:$0xf]  ;;  %v1560_v1 = vld [vmem:[%s2674_s0 + $0x4] sm:$0xf]  ;;  %1783 = vset.pattern.permute.xlu0 %v2004_v3 }
   0x2   :  { %v1784_v4 = vpack.i.bf16 %v1560_v1, %v28_v0  ;;  %140 = vperm.xlu0 %1783, %v2005_v5   ;;  %v2057_v6 = vshrl.u32 %v95_v2, 7 }
   0x4   :  { %1785 = vxpose.xlu1.b32.start.end [1/1] (short) (narrow) %v1784_v4, 16  ;;  %v97_v7 = vadd.s32 8, %v2057_v6 }
   0x6   :  { %vm101_vm0 = vcmp.lt.s32.totalorder %v97_v7, 15 }
   0x7   :  { %v138_v8 = vsel %vm101_vm0, 1, %v2004_v3 }
   0x8   :  { %143 = vperm.xlu0 %1783, %v138_v8  }
   0xc   :  { %120 = vperm.xlu0 %1783, %v2005_v5  }
   0xd   :  { %12 = vsyncpa [#allocation3], 0  ;;  %vm98_vm1 = vcmp.ge.s32.totalorder %v2057_v6, 1  ;;  %vm109_vm2 = vcmp.lt.s32.totalorder %v2057_v6, 1  ;;  %vm132_vm3 = vcmp.lt.s32.totalorder %v2057_v6, 7  ;;  %s2006_s29 = smov 4  }
   0xe   :  { %v114_v9 = vsel %vm98_vm1, 1, %v2004_v3  ;;  %v1917_v27 = vld [vmem:[%s2675_s1] sm:$0x3f]   ;;  %vm213_vm6 = vcmask 1045504   ;;  %s2007_s1 = smov 8   ;;  %vm183_vm9 = vcmask 31744  }
   0xf   :  { %1774 = vmatprep.subr.msk.bf16.mxu0 %vm213_vm6, %v1917_v27  ;;  %v215_v37 = vsel %vm213_vm6, %v1917_v27, 0  ;;  %vm188_vm10 = vcmask 64512   ;;  %vm206_vm11 = vcmask 97280   ;;  %v1923_v27 = vld [vmem:[%s2677_s3 + $0x28] sm:$0xff]   ;;  %s2008_s20 = smov 32   ;;  %s2009_s21 = smov 64  }
  0x10   :  { %1689 = vmatpush3.bf16.msra.mxu0 %v215_v37  ;;  %vm339_vm12 = vcmask 261120   ;;  %vm344_vm13 = vcmask 523264   ;;  %vm391_vm14 = vcmask 785408   ;;  %vm1508_vm15 = vcmask 125952  }
  0x22   :  { %1796 = vset.pattern.permute.xlu1 %v2004_v3 }
  0x26   :  { %117 = vperm.xlu1 %1796, %v114_v9   ;;  %v1918_v9 = vld [vmem:[%s2677_s3] sm:$0xff]  }
  0x27   :  { %1694 = vmatprep.subr.bf16.mxu1 %v1918_v9 }
  0x28   :  { %1695 = vmatpush3.bf16.msra.mxu1 %v1918_v9 }
  0x81   :  { %v2061_v11 = vpop.permute.xlu0 %140 }
  0x82   :  { %vm145_vm4 = vcmp.eq.s32.totalorder %v2061_v11, 1 }
  0x84   :  { %v1786_v10 = vpop.trf.xlu1 }
  0x85   :  { %v1790_v12 = vunpack.i.h.bf16 %v1786_v10  ;;  %v1787_v13 = vunpack.i.l.bf16 %v1786_v10  ;;  %v1919_v10 = vld [vmem:[%s2677_s3 + $0x8] sm:$0xff]  }
  0x86   :  { %1696 = vmatprep.subr.bf16.mxu1 %v1919_v10 }
  0x87   :  { %v107_v17 = vrot.slane %v1790_v12, 7  ;;  %v130_v18 = vrot.slane %v1790_v12, 1  ;;  %v128_v20 = vrot.slane %v1787_v13, 1  ;;  %v105_v24 = vrot.slane %v1787_v13, 7  ;;  %v2066_v25 = vpop.permute.xlu0 %143  ;;  %1697 = vmatpush3.bf16.msra.mxu1 %v1919_v10 }
  0x88   :  { %v1791_v14 = vpop.trf.xlu1  ;;  %vm146_vm5 = vcmp.eq.s32.totalorder %v2066_v25, 1 }
  0x89   :  { %v1795_v15 = vunpack.i.h.bf16 %v1791_v14  ;;  %v1792_v16 = vunpack.i.l.bf16 %v1791_v14  ;;  %v1921_v14 = vld [vmem:[%s2677_s3 + $0x18] sm:$0xff]  }
  0x8b   :  { %v108_v19 = vrot.slane %v1795_v15, 7  ;;  %v106_v21 = vrot.slane %v1792_v16, 7  ;;  %v129_v22 = vrot.slane %v1792_v16, 1  ;;  %v1797_v23 = vpack.i.bf16 %v1792_v16, %v1787_v13  ;;  %v2098_v44 = vpop.permute.xlu0 %120  ;;  %v1561_v13 = vld [vmem:[%s2676_s2] ss:$0 sm:$0xff] }
  0x8c   :  { %v131_v28 = vrot.slane %v1795_v15, 1  ;;  %v1802_v32 = vpack.i.bf16 %v1795_v15, %v1790_v12  ;;  %vm123_vm7 = vcmp.eq.s32.totalorder %v2098_v44, 1  ;;  %v1920_v12 = vld [vmem:[%s2677_s3 + $0x10] sm:$0xff]   ;;  %v1636_v44 = vld [vmem:[%s2680_s6] ss:$0 sm:$0xff] }
  0x8d   :  { %v110_v26 = vsel %vm109_vm2, %v107_v17, %v108_v19  ;;  %1798 = vrot.lane.b32.xlu0 %v1797_v23, %s2006_s29  ;;  %v134_v29 = vsel %vm132_vm3, %v129_v22, %v130_v18  ;;  %v135_v30 = vsel %vm132_vm3, %v128_v20, %v129_v22  ;;  %v111_v31 = vsel %vm109_vm2, %v106_v21, %v107_v17  ;;  %v1922_v23 = vld [vmem:[%s2677_s3 + $0x20] sm:$0xff]  }
  0x8e   :  { %v112_v33 = vsel %vm109_vm2, %v105_v24, %v106_v21  ;;  %v147_v34 = vsel %vm145_vm4, %v135_v30, 0.0  ;;  %v148_v35 = vsel %vm146_vm5, %v134_v29, 0.0  ;;  %v113_v36 = vsel %vm109_vm2, %v108_v19, %v105_v24  ;;  %1698 = vmatprep.subr.bf16.mxu1 %v1920_v12 }
  0x8f   :  { %v133_v38 = vsel %vm132_vm3, %v130_v18, %v131_v28  ;;  %v136_v39 = vsel %vm132_vm3, %v131_v28, %v128_v20  ;;  %v1807_v40 = vpack.i.bf16 %v148_v35, %v147_v34  ;;  %v125_v54 = vsel %vm123_vm7, %v112_v33, 0.0  ;;  %1699 = vmatpush3.bf16.msra.mxu1 %v1920_v12 }
  0x90   :  { %v149_v41 = vsel %vm145_vm4, %v133_v38, 0.0  ;;  %v150_v42 = vsel %vm146_vm5, %v136_v39, 0.0  ;;  %v127_v0 = vsel %vm123_vm7, %v110_v26, 0.0  ;;  %1700 = vmatprep.subr.bf16.mxu1 %v1921_v14 }
  0x91   :  { %1803 = vrot.lane.b32.xlu0 %v1802_v32, %s2006_s29  ;;  %v1812_v43 = vpack.i.bf16 %v150_v42, %v149_v41 }
  0x93   :  { %1701 = vmatpush3.bf16.msra.mxu1 %v1921_v14 }
  0x94   :  { %1702 = vmatprep.subr.bf16.mxu1 %v1922_v23 }
  0x95   :  { %1808 = vrot.lane.b32.xlu0 %v1807_v40, %s2007_s1 }
  0x97   :  { %1703 = vmatpush3.bf16.msra.mxu1 %v1922_v23  ;;  %v2200_v23 = vsub.s32 0, %v2057_v6 }
  0x98   :  { %1704 = vmatprep.subr.bf16.mxu1 %v1923_v27 }
  0x99   :  { %1813 = vrot.lane.b32.xlu0 %v1812_v43, %s2007_s1  ;;  %s2010_s1 = smov [#allocation2]  }
  0x9a   :  { %s1549_s30 = sshll.u32 %s2010_s1, 4  ;;  %s1550_s30 = int_to_ptr.vmem [resolvable:$true] %s1549_s30 }
  0x9b   :  { %1705 = vmatpush3.bf16.msra.mxu1 %v1923_v27  ;;  %s1980_s6 = scalar_lea.vmem %s1550_s30, 128  ;;  %p1985_p1 = scmp.lt.s32.totalorder %s1550_s30, %s1550_s30 }
  0x9c   :  { %p1981_p0 = scmp.ne.s32.totalorder %s1550_s30, %s1980_s6  ;;  %p1986_p2 = scmp.lt.s32.totalorder %s1980_s6, %s1980_s6 }
  0x9e   :  { %p1987_p3 = por %p1986_p2, %p1985_p1 }
  0xa0   :  { %p1988_p4 = pnand %p1987_p3, %p1981_p0 }
  0xa5   :  { %v2100_v46 = vpop.permute.xlu1 %117 }
  0xa6   :  { %vm122_vm8 = vcmp.eq.s32.totalorder %v2100_v46, 1 }
  0xa7   :  { %v124_v53 = vsel %vm122_vm8, %v113_v36, 0.0  ;;  %v126_v63 = vsel %vm122_vm8, %v111_v31, 0.0 }
  0xff   :  { %v1799_v45 = vpop.permute.xlu0 %1798 }
 0x100   :  { %v1801_v48 = vunpack.i.h.bf16 %v1799_v45  ;;  %v1800_v49 = vunpack.i.l.bf16 %v1799_v45 }
 0x102   :  { %v184_v57 = vsel %vm183_vm9, %v124_v53, %v1800_v49  ;;  %v185_v58 = vsel %vm183_vm9, %v125_v54, %v1801_v48 }
 0x103   :  { %v1804_v47 = vpop.permute.xlu0 %1803 }
 0x104   :  { %v1806_v55 = vunpack.i.h.bf16 %v1804_v47  ;;  %v1805_v56 = vunpack.i.l.bf16 %v1804_v47 }
 0x106   :  { %v187_v3 = vsel %vm183_vm9, %v127_v0, %v1806_v55  ;;  %v186_v4 = vsel %vm183_vm9, %v126_v63, %v1805_v56 }
 0x107   :  { %v1809_v50 = vpop.permute.xlu0 %1808 }
 0x108   :  { %v1811_v51 = vunpack.i.h.bf16 %v1809_v50  ;;  %v1810_v52 = vunpack.i.l.bf16 %v1809_v50 }
 0x10a   :  { %v189_v59 = vsel %vm188_vm10, %v184_v57, %v1810_v52  ;;  %v190_v60 = vsel %vm188_vm10, %v185_v58, %v1811_v51 }
 0x10b   :  { %v1814_v61 = vpop.permute.xlu0 %1813  ;;  %v193_v62 = vpack.c.bf16 %v190_v60, %v189_v59 }
 0x10c   :  { %v1816_v1 = vunpack.i.h.bf16 %v1814_v61  ;;  %v1815_v2 = vunpack.i.l.bf16 %v1814_v61 }
 0x10d   :  { %1690 = vmatprep.mubr.msk.bf16.mxu0 %vm206_vm11, %v193_v62 }
 0x10e   :  { %v191_v5 = vsel %vm188_vm10, %v186_v4, %v1815_v2  ;;  %v192_v7 = vsel %vm188_vm10, %v187_v3, %v1816_v1 }
 0x10f   :  { %v194_v8 = vpack.c.bf16 %v192_v7, %v191_v5 }
 0x111   :  { %1691 = vmatmul.mubr.msk.bf16.vlgmr.msra.gmra.mrb[0].mxu0 %vm206_vm11, %v194_v8 }
 0x1e4   :  { %v1692_v15 = vpop.f32.mrb[0].mxu0 }
 0x1e5   :  { %v2135_v16 = vadd.f32 %v1692_v15, %v1561_v13  ;;  %v251_v17 = vpop.f32.mrb[1].mxu0 }
 0x1e6   :  { %v2137_v18 = vadd.f32 %v1561_v13, %v251_v17  ;;  %v1693_v19 = vpop.f32.mrb[2].mxu0 }
 0x1e7   :  { %v269_v20 = vmax.f32 %v2135_v16, 0.0  ;;  %v2140_v21 = vadd.f32 %v1693_v19, %v1561_v13  ;;  %v254_v22 = vpop.f32.mrb[3].mxu0 }
 0x1e8   :  { %v267_v24 = vmax.f32 %v2137_v18, 0.0  ;;  %v2146_v26 = vadd.f32 %v1561_v13, %v254_v22 }
 0x1e9   :  { %v270_v28 = vmax.f32 %v2140_v21, 0.0  ;;  %v285_v29 = vrot.slane %v269_v20, 7  ;;  %v297_v33 = vrot.slane %v269_v20, 1 }
 0x1ea   :  { %v283_v30 = vrot.slane %v267_v24, 7  ;;  %v295_v31 = vrot.slane %v267_v24, 1  ;;  %v268_v32 = vmax.f32 %v2146_v26, 0.0 }
 0x1eb   :  { %v286_v34 = vrot.slane %v270_v28, 7  ;;  %v298_v35 = vrot.slane %v270_v28, 1  ;;  %v1817_v36 = vpack.i.bf16 %v270_v28, %v269_v20 }
 0x1ec   :  { %v284_v37 = vrot.slane %v268_v32, 7  ;;  %v296_v38 = vrot.slane %v268_v32, 1  ;;  %v1822_v49 = vpack.i.bf16 %v268_v32, %v267_v24  ;;  %v2205_v24 = vld [vmem:[%s2678_s4] sm:$0x7] }
 0x1ed   :  { %1818 = vrot.lane.b32.xlu0 %v1817_v36, %s2008_s20  ;;  %v299_v39 = vsel %vm132_vm3, %v297_v33, %v298_v35  ;;  %v302_v40 = vsel %vm132_vm3, %v298_v35, %v295_v31  ;;  %v287_v41 = vsel %vm109_vm2, %v285_v29, %v286_v34  ;;  %v290_v42 = vsel %vm109_vm2, %v286_v34, %v283_v30 }
 0x1ee   :  { %v305_v43 = vsel %vm145_vm4, %v299_v39, 0.0  ;;  %v306_v45 = vsel %vm146_vm5, %v302_v40, 0.0  ;;  %v300_v47 = vsel %vm132_vm3, %v296_v38, %v297_v33  ;;  %v301_v48 = vsel %vm132_vm3, %v295_v31, %v296_v38 }
 0x1ef   :  { %v1832_v50 = vpack.i.bf16 %v306_v45, %v305_v43  ;;  %v288_v51 = vsel %vm109_vm2, %v284_v37, %v285_v29  ;;  %v303_v52 = vsel %vm145_vm4, %v301_v48, 0.0  ;;  %v304_v53 = vsel %vm146_vm5, %v300_v47, 0.0 }
 0x1f0   :  { %v289_v54 = vsel %vm109_vm2, %v283_v30, %v284_v37  ;;  %v1827_v55 = vpack.i.bf16 %v304_v53, %v303_v52  ;;  %v293_v61 = vsel %vm122_vm8, %v288_v51, 0.0  ;;  %v294_v62 = vsel %vm123_vm7, %v287_v41, 0.0  ;;  %v1925_v51 = vld [vmem:[%s2677_s3 + $0x38] sm:$0xff]   ;;  %v1926_v52 = vld [vmem:[%s2677_s3 + $0x40] sm:$0xff]  }
 0x1f1   :  { %1823 = vrot.lane.b32.xlu0 %v1822_v49, %s2008_s20  ;;  %1833 = vrot.lane.b32.xlu1 %v1832_v50, %s2009_s21  ;;  %v291_v13 = vsel %vm122_vm8, %v290_v42, 0.0  ;;  %v292_v14 = vsel %vm123_vm7, %v289_v54, 0.0  ;;  %v354_v27 = vrot.slane %v2205_v24, %v2200_v23  ;;  %v1924_v50 = vld [vmem:[%s2677_s3 + $0x30] sm:$0xff]  }
 0x1f2   :  { %1710 = vmatprep.subr.bf16.mxu0 %v1924_v50 }
 0x1f3   :  { %1711 = vmatpush3.bf16.msra.mxu0 %v1924_v50 }
 0x1f4   :  { %1712 = vmatprep.subr.bf16.mxu0 %v1925_v51 }
 0x1f5   :  { %1828 = vrot.lane.b32.xlu0 %v1827_v55, %s2009_s21 }
 0x1f7   :  { %1713 = vmatpush3.bf16.msra.mxu0 %v1925_v51 }
 0x1f8   :  { %1714 = vmatprep.subr.bf16.mxu0 %v1926_v52 }
 0x1fb   :  { %1715 = vmatpush3.bf16.msra.mxu0 %v1926_v52 }
 0x25f   :  { %v1819_v56 = vpop.permute.xlu0 %1818 }
 0x260   :  { %v1821_v57 = vunpack.i.h.bf16 %v1819_v56  ;;  %v1820_v58 = vunpack.i.l.bf16 %v1819_v56 }
 0x262   :  { %v342_v1 = vsel %vm339_vm12, %v293_v61, %v1820_v58  ;;  %v343_v2 = vsel %vm339_vm12, %v294_v62, %v1821_v57 }
 0x263   :  { %v1824_v59 = vpop.permute.xlu0 %1823  ;;  %v1834_v60 = vpop.permute.xlu1 %1833 }
 0x264   :  { %v1836_v63 = vunpack.i.h.bf16 %v1834_v60  ;;  %v1835_v0 = vunpack.i.l.bf16 %v1834_v60  ;;  %v1826_v3 = vunpack.i.h.bf16 %v1824_v59  ;;  %v1825_v4 = vunpack.i.l.bf16 %v1824_v59 }
 0x266   :  { %v348_v5 = vsel %vm344_vm13, %v343_v2, %v1836_v63  ;;  %v347_v7 = vsel %vm344_vm13, %v342_v1, %v1835_v0  ;;  %v340_v15 = vsel %vm339_vm12, %v291_v13, %v1825_v4  ;;  %v341_v17 = vsel %vm339_vm12, %v292_v14, %v1826_v3 }
 0x267   :  { %v350_v8 = vpack.c.bf16 %v348_v5, %v347_v7  ;;  %v1829_v9 = vpop.permute.xlu0 %1828 }
 0x268   :  { %v1831_v10 = vunpack.i.h.bf16 %v1829_v9  ;;  %v1830_v12 = vunpack.i.l.bf16 %v1829_v9 }
 0x26a   :  { %v345_v19 = vsel %vm344_vm13, %v340_v15, %v1830_v12  ;;  %v346_v20 = vsel %vm344_vm13, %v341_v17, %v1831_v10 }
 0x26b   :  { %v349_v22 = vpack.c.bf16 %v346_v20, %v345_v19  ;;  %v2247_v19 = vsub.s32 1, %v2057_v6 }
 0x26d   :  { %1706 = vmatprep.mubr.msk.bf16.mxu1 %vm391_vm14, %v349_v22  ;;  %v2250_v22 = vsub.s32 2, %v2057_v6 }
 0x26e   :  { %1707 = vmatmul.mubr.msk.bf16.vlgmr.msra.gmra.mrb[0].mxu1 %vm391_vm14, %v350_v8 }
 0x341   :  { %v1708_v28 = vpop.f32.mrb[0].mxu1 }
 0x342   :  { %v2209_v29 = vadd.f32 %v1708_v28, %v354_v27  ;;  %v432_v30 = vpop.f32.mrb[1].mxu1  ;;  %v511_v28 = vrot.slane %v2205_v24, %v2247_v19 }
 0x343   :  { %v2211_v31 = vadd.f32 %v432_v30, %v354_v27  ;;  %v1709_v32 = vpop.f32.mrb[2].mxu1 }
 0x344   :  { %v435_v33 = vpop.f32.mrb[3].mxu1  ;;  %v453_v34 = vsel %vm339_vm12, %v2209_v29, 0.0  ;;  %v2221_v38 = vadd.f32 %v1709_v32, %v354_v27  ;;  %v466_v41 = vmul.f32 %v2209_v29, %v2209_v29 }
 0x345   :  { %v2215_v35 = vadd.f32 %v435_v33, %v354_v27  ;;  %454 = vadd.xlane.f32.xlu0 %v453_v34  ;;  %v464_v37 = vmul.f32 %v2211_v31, %v2211_v31  ;;  %v447_v39 = vsel %vm339_vm12, %v2211_v31, 0.0  ;;  %v519_v33 = vrot.slane %v2205_v24, %v2250_v22 }
 0x346   :  { %v456_v42 = vsel %vm339_vm12, %v2221_v38, 0.0  ;;  %v474_v45 = vsel %vm339_vm12, %v466_v41, 0.0  ;;  %v467_v48 = vmul.f32 %v2221_v38, %v2221_v38 }
 0x347   :  { %v450_v36 = vsel %vm339_vm12, %v2215_v35, 0.0  ;;  %v468_v40 = vsel %vm339_vm12, %v464_v37, 0.0  ;;  %v465_v43 = vmul.f32 %v2215_v35, %v2215_v35 }
 0x348   :  { %451 = vadd.xlane.f32.xlu1 %v450_v36  ;;  %v477_v49 = vsel %vm339_vm12, %v467_v48, 0.0 }
 0x349   :  { %448 = vadd.xlane.f32.xlu0 %v447_v39  ;;  %v471_v47 = vsel %vm339_vm12, %v465_v43, 0.0 }
 0x34c   :  { %469 = vadd.xlane.f32.xlu1 %v468_v40 }
 0x34d   :  { %457 = vadd.xlane.f32.xlu0 %v456_v42 }
 0x350   :  { %475 = vadd.xlane.f32.xlu1 %v474_v45  ;;  %v1927_v45 = vld [vmem:[%s2677_s3 + $0x48] sm:$0xff]  }
 0x351   :  { %472 = vadd.xlane.f32.xlu0 %v471_v47  ;;  %1716 = vmatprep.subr.bf16.mxu0 %v1927_v45 }
 0x352   :  { %1717 = vmatpush3.bf16.msra.mxu0 %v1927_v45 }
 0x355   :  { %478 = vadd.xlane.f32.xlu0 %v477_v49 }
 0x3d2   :  { %v455_v53 = vpop.xlane.xlu0 %454 }
 0x3d3   :  { %v462_v59 = vmul.f32 0.03125, %v455_v53 }
 0x3d5   :  { %v452_v54 = vpop.xlane.xlu1 %451  ;;  %v486_v1 = vmul.f32 %v462_v59, %v462_v59  ;;  %v494_v36 = vsub.f32 %v2209_v29, %v462_v59  ;;  %v1929_v59 = vld [vmem:[%s2677_s3 + $0x58] sm:$0xff]  }
 0x3d6   :  { %v449_v55 = vpop.xlane.xlu0 %448  ;;  %v461_v62 = vmul.f32 0.03125, %v452_v54 }
 0x3d7   :  { %v460_v56 = vmul.f32 0.03125, %v449_v55 }
 0x3d8   :  { %v485_v5 = vmul.f32 %v461_v62, %v461_v62  ;;  %v493_v40 = vsub.f32 %v2215_v35, %v461_v62  ;;  %v1928_v35 = vld [vmem:[%s2677_s3 + $0x50] sm:$0xff]  }
 0x3d9   :  { %v484_v57 = vmul.f32 %v460_v56, %v460_v56  ;;  %v470_v58 = vpop.xlane.xlu1 %469  ;;  %v492_v30 = vsub.f32 %v2211_v31, %v460_v56  ;;  %1718 = vmatprep.subr.bf16.mxu0 %v1928_v35 }
 0x3da   :  { %v480_v60 = vmul.f32 0.03125, %v470_v58  ;;  %v458_v61 = vpop.xlane.xlu0 %457  ;;  %1719 = vmatpush3.bf16.msra.mxu0 %v1928_v35 }
 0x3db   :  { %v463_v7 = vmul.f32 0.03125, %v458_v61  ;;  %1720 = vmatprep.subr.bf16.mxu0 %v1929_v59 }
 0x3dc   :  { %v488_v63 = vsub.f32 %v480_v60, %v484_v57 }
 0x3dd   :  { %v476_v0 = vpop.xlane.xlu1 %475  ;;  %v487_v14 = vmul.f32 %v463_v7, %v463_v7  ;;  %v495_v48 = vsub.f32 %v2221_v38, %v463_v7 }
 0x3de   :  { %v496_v2 = vadd.f32 1e-05, %v488_v63  ;;  %v482_v3 = vmul.f32 0.03125, %v476_v0  ;;  %v473_v4 = vpop.xlane.xlu0 %472  ;;  %1721 = vmatpush3.bf16.msra.mxu0 %v1929_v59 }
 0x3df   :  { %v481_v8 = vmul.f32 0.03125, %v473_v4 }
 0x3e0   :  { %1948 = vrsqrt.f32 %v496_v2  ;;  %v490_v9 = vsub.f32 %v482_v3, %v486_v1 }
 0x3e1   :  { %v489_v10 = vsub.f32 %v481_v8, %v485_v5 }
 0x3e2   :  { %v498_v12 = vadd.f32 1e-05, %v490_v9  ;;  %v479_v13 = vpop.xlane.xlu0 %478 }
 0x3e3   :  { %v497_v15 = vadd.f32 1e-05, %v489_v10  ;;  %v483_v17 = vmul.f32 0.03125, %v479_v13 }
 0x3e4   :  { %1950 = vrsqrt.f32 %v498_v12 }
 0x3e5   :  { %1952 = vrsqrt.f32 %v497_v15  ;;  %v491_v20 = vsub.f32 %v483_v17, %v487_v14 }
 0x3e7   :  { %v499_v27 = vadd.f32 1e-05, %v491_v20 }
 0x3e9   :  { %1954 = vrsqrt.f32 %v499_v27 }
 0x3ea   :  { %v1949_v32 = vpop.eup %1948 }
 0x3eb   :  { %v504_v34 = vmul.f32 %v1949_v32, %v492_v30 }
 0x3ed   :  { %v512_v37 = vmul.f32 %v511_v28, %v504_v34 }
 0x3ee   :  { %v1951_v39 = vpop.eup %1950 }
 0x3ef   :  { %v1953_v41 = vpop.eup %1952  ;;  %v506_v42 = vmul.f32 %v1951_v39, %v494_v36  ;;  %v520_v43 = vadd.f32 %v519_v33, %v512_v37 }
 0x3f0   :  { %v505_v31 = vmul.f32 %v1953_v41, %v493_v40 }
 0x3f1   :  { %v514_v47 = vmul.f32 %v511_v28, %v506_v42  ;;  %v526_v29 = vmax.f32 %v520_v43, 0.0 }
 0x3f2   :  { %v513_v24 = vmul.f32 %v511_v28, %v505_v31 }
 0x3f3   :  { %v1955_v49 = vpop.eup %1954  ;;  %v522_v50 = vadd.f32 %v519_v33, %v514_v47  ;;  %v543_v56 = vrot.slane %v526_v29, 7  ;;  %v555_v57 = vrot.slane %v526_v29, 1 }
 0x3f4   :  { %v521_v51 = vadd.f32 %v519_v33, %v513_v24  ;;  %v507_v52 = vmul.f32 %v1955_v49, %v495_v48 }
 0x3f5   :  { %v528_v53 = vmax.f32 %v522_v50, 0.0 }
 0x3f6   :  { %v527_v54 = vmax.f32 %v521_v51, 0.0  ;;  %v515_v55 = vmul.f32 %v511_v28, %v507_v52 }
 0x3f7   :  { %v557_v58 = vrot.slane %v528_v53, 1  ;;  %v545_v38 = vrot.slane %v528_v53, 7 }
 0x3f8   :  { %v1842_v60 = vpack.i.bf16 %v527_v54, %v526_v29  ;;  %v544_v61 = vrot.slane %v527_v54, 7  ;;  %v556_v62 = vrot.slane %v527_v54, 1  ;;  %v523_v63 = vadd.f32 %v519_v33, %v515_v55 }
 0x3fa   :  { %1843 = vrot.lane.b32.xlu1 %v1842_v60, %s2008_s20  ;;  %v560_v0 = vsel %vm132_vm3, %v556_v62, %v557_v58  ;;  %v561_v1 = vsel %vm132_vm3, %v555_v57, %v556_v62  ;;  %v529_v2 = vmax.f32 %v523_v63, 0.0  ;;  %v549_v3 = vsel %vm109_vm2, %v543_v56, %v544_v61 }
 0x3fb   :  { %v563_v4 = vsel %vm145_vm4, %v561_v1, 0.0  ;;  %v564_v5 = vsel %vm146_vm5, %v560_v0, 0.0  ;;  %v548_v7 = vsel %vm109_vm2, %v544_v61, %v545_v38  ;;  %v552_v39 = vsel %vm123_vm7, %v549_v3, 0.0 }
 0x3fc   :  { %v1847_v8 = vpack.i.bf16 %v564_v5, %v563_v4  ;;  %v1837_v9 = vpack.i.bf16 %v529_v2, %v528_v53  ;;  %v546_v10 = vrot.slane %v529_v2, 7  ;;  %v558_v12 = vrot.slane %v529_v2, 1 }
 0x3fd   :  { %v553_v29 = vsel %vm122_vm8, %v548_v7, 0.0 }
 0x3fe   :  { %1848 = vrot.lane.b32.xlu1 %v1847_v8, %s2009_s21  ;;  %1838 = vrot.lane.b32.xlu0 %v1837_v9, %s2008_s20  ;;  %v559_v13 = vsel %vm132_vm3, %v557_v58, %v558_v12  ;;  %v562_v14 = vsel %vm132_vm3, %v558_v12, %v555_v57  ;;  %v550_v15 = vsel %vm109_vm2, %v546_v10, %v543_v56  ;;  %v2318_v57 = vld [vmem:[%s2678_s4 + $0x4] sm:$0x7] }
 0x3ff   :  { %v565_v17 = vsel %vm145_vm4, %v559_v13, 0.0  ;;  %v566_v20 = vsel %vm146_vm5, %v562_v14, 0.0  ;;  %v547_v27 = vsel %vm109_vm2, %v545_v38, %v546_v10  ;;  %v551_v37 = vsel %vm122_vm8, %v550_v15, 0.0 }
 0x400   :  { %v1852_v28 = vpack.i.bf16 %v566_v20, %v565_v17  ;;  %v554_v50 = vsel %vm123_vm7, %v547_v27, 0.0  ;;  %v612_v58 = vrot.slane %v2318_v57, %v2200_v23  ;;  %v1930_v17 = vld [vmem:[%s2677_s3 + $0x60] sm:$0xff]   ;;  %v1931_v20 = vld [vmem:[%s2677_s3 + $0x68] sm:$0xff]   ;;  %v1932_v27 = vld [vmem:[%s2677_s3 + $0x70] sm:$0xff]  }
 0x401   :  { %1726 = vmatprep.subr.bf16.mxu1 %v1930_v17 }
 0x402   :  { %1853 = vrot.lane.b32.xlu1 %v1852_v28, %s2009_s21  ;;  %1727 = vmatpush3.bf16.msra.mxu1 %v1930_v17 }
 0x403   :  { %1728 = vmatprep.subr.bf16.mxu1 %v1931_v20 }
 0x406   :  { %1729 = vmatpush3.bf16.msra.mxu1 %v1931_v20 }
 0x407   :  { %1730 = vmatprep.subr.bf16.mxu1 %v1932_v27 }
 0x40a   :  { %1731 = vmatpush3.bf16.msra.mxu1 %v1932_v27 }
 0x46c   :  { %v1844_v30 = vpop.permute.xlu1 %1843 }
 0x46d   :  { %v1846_v32 = vunpack.i.h.bf16 %v1844_v30  ;;  %v1845_v33 = vunpack.i.l.bf16 %v1844_v30 }
 0x46f   :  { %v599_v42 = vsel %vm339_vm12, %v551_v37, %v1845_v33  ;;  %v600_v43 = vsel %vm339_vm12, %v552_v39, %v1846_v32 }
 0x470   :  { %v1849_v34 = vpop.permute.xlu1 %1848  ;;  %v1839_v36 = vpop.permute.xlu0 %1838 }
 0x471   :  { %v1851_v40 = vunpack.i.h.bf16 %v1849_v34  ;;  %v1850_v41 = vunpack.i.l.bf16 %v1849_v34  ;;  %v1841_v45 = vunpack.i.h.bf16 %v1839_v36  ;;  %v1840_v31 = vunpack.i.l.bf16 %v1839_v36 }
 0x473   :  { %v603_v47 = vsel %vm344_vm13, %v599_v42, %v1850_v41  ;;  %v604_v48 = vsel %vm344_vm13, %v600_v43, %v1851_v40  ;;  %v601_v52 = vsel %vm339_vm12, %v553_v29, %v1840_v31  ;;  %v602_v53 = vsel %vm339_vm12, %v554_v50, %v1841_v45 }
 0x474   :  { %v607_v24 = vpack.c.bf16 %v604_v48, %v603_v47  ;;  %v1854_v49 = vpop.permute.xlu1 %1853 }
 0x475   :  { %v1856_v35 = vunpack.i.h.bf16 %v1854_v49  ;;  %v1855_v51 = vunpack.i.l.bf16 %v1854_v49 }
 0x476   :  { %1722 = vmatprep.mubr.msk.bf16.mxu0 %vm391_vm14, %v607_v24 }
 0x477   :  { %v605_v54 = vsel %vm344_vm13, %v601_v52, %v1855_v51  ;;  %v606_v55 = vsel %vm344_vm13, %v602_v53, %v1856_v35 }
 0x478   :  { %v608_v56 = vpack.c.bf16 %v606_v55, %v605_v54 }
 0x47a   :  { %1723 = vmatmul.mubr.msk.bf16.vlgmr.msra.gmra.mrb[4].mxu0 %vm391_vm14, %v608_v56 }
 0x54d   :  { %v1724_v38 = vpop.f32.mrb[4].mxu0 }
 0x54e   :  { %v2322_v59 = vadd.f32 %v1724_v38, %v612_v58  ;;  %v689_v60 = vpop.f32.mrb[5].mxu0  ;;  %v767_v38 = vrot.slane %v2318_v57, %v2247_v19 }
 0x54f   :  { %v2324_v61 = vadd.f32 %v689_v60, %v612_v58  ;;  %v1725_v62 = vpop.f32.mrb[6].mxu0 }
 0x550   :  { %v692_v63 = vpop.f32.mrb[7].mxu0  ;;  %v710_v0 = vsel %vm339_vm12, %v2322_v59, 0.0  ;;  %v2334_v4 = vadd.f32 %v1725_v62, %v612_v58  ;;  %v722_v8 = vmul.f32 %v2322_v59, %v2322_v59 }
 0x551   :  { %v2328_v1 = vadd.f32 %v692_v63, %v612_v58  ;;  %711 = vadd.xlane.f32.xlu0 %v710_v0  ;;  %v720_v3 = vmul.f32 %v2324_v61, %v2324_v61  ;;  %v704_v5 = vsel %vm339_vm12, %v2324_v61, 0.0  ;;  %v775_v63 = vrot.slane %v2318_v57, %v2250_v22 }
 0x552   :  { %v713_v9 = vsel %vm339_vm12, %v2334_v4, 0.0  ;;  %v730_v12 = vsel %vm339_vm12, %v722_v8, 0.0  ;;  %v723_v14 = vmul.f32 %v2334_v4, %v2334_v4 }
 0x553   :  { %v707_v2 = vsel %vm339_vm12, %v2328_v1, 0.0  ;;  %v724_v7 = vsel %vm339_vm12, %v720_v3, 0.0  ;;  %v721_v10 = vmul.f32 %v2328_v1, %v2328_v1 }
 0x554   :  { %708 = vadd.xlane.f32.xlu1 %v707_v2  ;;  %v733_v15 = vsel %vm339_vm12, %v723_v14, 0.0 }
 0x555   :  { %705 = vadd.xlane.f32.xlu0 %v704_v5  ;;  %v727_v13 = vsel %vm339_vm12, %v721_v10, 0.0 }
 0x558   :  { %725 = vadd.xlane.f32.xlu1 %v724_v7 }
 0x559   :  { %714 = vadd.xlane.f32.xlu0 %v713_v9 }
 0x55c   :  { %731 = vadd.xlane.f32.xlu1 %v730_v12 }
 0x55d   :  { %728 = vadd.xlane.f32.xlu0 %v727_v13 }
 0x561   :  { %734 = vadd.xlane.f32.xlu0 %v733_v15 }
 0x5de   :  { %v712_v28 = vpop.xlane.xlu0 %711 }
 0x5df   :  { %v718_v37 = vmul.f32 0.03125, %v712_v28 }
 0x5e1   :  { %v709_v30 = vpop.xlane.xlu1 %708  ;;  %v742_v45 = vmul.f32 %v718_v37, %v718_v37  ;;  %v750_v2 = vsub.f32 %v2322_v59, %v718_v37 }
 0x5e2   :  { %v706_v32 = vpop.xlane.xlu0 %705  ;;  %v717_v41 = vmul.f32 0.03125, %v709_v30 }
 0x5e3   :  { %v716_v33 = vmul.f32 0.03125, %v706_v32 }
 0x5e4   :  { %v741_v24 = vmul.f32 %v717_v41, %v717_v41  ;;  %v749_v7 = vsub.f32 %v2328_v1, %v717_v41 }
 0x5e5   :  { %v740_v34 = vmul.f32 %v716_v33, %v716_v33  ;;  %v726_v36 = vpop.xlane.xlu1 %725  ;;  %v748_v60 = vsub.f32 %v2324_v61, %v716_v33  ;;  %v1933_v61 = vld [vmem:[%s2677_s3 + $0x78] sm:$0xff]  }
 0x5e6   :  { %v736_v39 = vmul.f32 0.03125, %v726_v36  ;;  %v715_v40 = vpop.xlane.xlu0 %714  ;;  %1732 = vmatprep.subr.bf16.mxu1 %v1933_v61 }
 0x5e7   :  { %v719_v49 = vmul.f32 0.03125, %v715_v40  ;;  %1733 = vmatpush3.bf16.msra.mxu1 %v1933_v61  ;;  %v1935_v40 = vld [vmem:[%s2677_s3 + $0x88] sm:$0xff]  }
 0x5e8   :  { %v744_v42 = vsub.f32 %v736_v39, %v740_v34 }
 0x5e9   :  { %v732_v43 = vpop.xlane.xlu1 %731  ;;  %v743_v53 = vmul.f32 %v719_v49, %v719_v49  ;;  %v751_v57 = vsub.f32 %v2334_v4, %v719_v49 }
 0x5ea   :  { %v752_v31 = vadd.f32 1e-05, %v744_v42  ;;  %v738_v47 = vmul.f32 0.03125, %v732_v43  ;;  %v729_v48 = vpop.xlane.xlu0 %728 }
 0x5eb   :  { %v737_v29 = vmul.f32 0.03125, %v729_v48 }
 0x5ec   :  { %1956 = vrsqrt.f32 %v752_v31  ;;  %v746_v50 = vsub.f32 %v738_v47, %v742_v45 }
 0x5ed   :  { %v745_v35 = vsub.f32 %v737_v29, %v741_v24 }
 0x5ee   :  { %v754_v51 = vadd.f32 1e-05, %v746_v50  ;;  %v735_v52 = vpop.xlane.xlu0 %734 }
 0x5ef   :  { %v753_v54 = vadd.f32 1e-05, %v745_v35  ;;  %v739_v55 = vmul.f32 0.03125, %v735_v52 }
 0x5f0   :  { %1958 = vrsqrt.f32 %v754_v51 }
 0x5f1   :  { %1960 = vrsqrt.f32 %v753_v54  ;;  %v747_v56 = vsub.f32 %v739_v55, %v743_v53 }
 0x5f3   :  { %v755_v58 = vadd.f32 1e-05, %v747_v56 }
 0x5f5   :  { %1962 = vrsqrt.f32 %v755_v58 }
 0x5f6   :  { %v1957_v62 = vpop.eup %1956 }
 0x5f7   :  { %v760_v0 = vmul.f32 %v1957_v62, %v748_v60 }
 0x5f9   :  { %v768_v3 = vmul.f32 %v767_v38, %v760_v0 }
 0x5fa   :  { %v1959_v5 = vpop.eup %1958 }
 0x5fb   :  { %v1961_v8 = vpop.eup %1960  ;;  %v762_v9 = vmul.f32 %v1959_v5, %v750_v2  ;;  %v776_v10 = vadd.f32 %v775_v63, %v768_v3 }
 0x5fc   :  { %v761_v12 = vmul.f32 %v1961_v8, %v749_v7 }
 0x5fd   :  { %v770_v13 = vmul.f32 %v767_v38, %v762_v9  ;;  %v2367_v14 = vadd.f32 %v776_v10, %v2137_v18  ;;  %v1934_v18 = vld [vmem:[%s2677_s3 + $0x80] sm:$0xff]  }
 0x5fe   :  { %v769_v15 = vmul.f32 %v767_v38, %v761_v12  ;;  %1734 = vmatprep.subr.bf16.mxu1 %v1934_v18 }
 0x5ff   :  { %v1963_v59 = vpop.eup %1962  ;;  %v778_v17 = vadd.f32 %v775_v63, %v770_v13  ;;  %v786_v27 = vmax.f32 %v2367_v14, 0.0  ;;  %1735 = vmatpush3.bf16.msra.mxu1 %v1934_v18 }
 0x600   :  { %v763_v20 = vmul.f32 %v1963_v59, %v751_v57  ;;  %v777_v1 = vadd.f32 %v775_v63, %v769_v15  ;;  %1736 = vmatprep.subr.bf16.mxu1 %v1935_v40 }
 0x601   :  { %v2375_v28 = vadd.f32 %v778_v17, %v2135_v16  ;;  %v803_v36 = vrot.slane %v786_v27, 7  ;;  %v815_v37 = vrot.slane %v786_v27, 1 }
 0x602   :  { %v2381_v30 = vadd.f32 %v777_v1, %v2146_v26  ;;  %v771_v4 = vmul.f32 %v767_v38, %v763_v20 }
 0x603   :  { %v788_v32 = vmax.f32 %v2375_v28, 0.0  ;;  %1737 = vmatpush3.bf16.msra.mxu1 %v1935_v40 }
 0x604   :  { %v787_v33 = vmax.f32 %v2381_v30, 0.0  ;;  %v779_v34 = vadd.f32 %v775_v63, %v771_v4 }
 0x605   :  { %v817_v39 = vrot.slane %v788_v32, 1  ;;  %v805_v16 = vrot.slane %v788_v32, 7 }
 0x606   :  { %v1862_v41 = vpack.i.bf16 %v787_v33, %v786_v27  ;;  %v804_v42 = vrot.slane %v787_v33, 7  ;;  %v816_v26 = vrot.slane %v787_v33, 1  ;;  %v2389_v43 = vadd.f32 %v779_v34, %v2140_v21 }
 0x608   :  { %1863 = vrot.lane.b32.xlu1 %v1862_v41, %s2008_s20  ;;  %v820_v45 = vsel %vm132_vm3, %v816_v26, %v817_v39  ;;  %v821_v31 = vsel %vm132_vm3, %v815_v37, %v816_v26  ;;  %v789_v47 = vmax.f32 %v2389_v43, 0.0  ;;  %v809_v48 = vsel %vm109_vm2, %v803_v36, %v804_v42 }
 0x609   :  { %v823_v24 = vsel %vm145_vm4, %v821_v31, 0.0  ;;  %v824_v21 = vsel %vm146_vm5, %v820_v45, 0.0  ;;  %v808_v49 = vsel %vm109_vm2, %v804_v42, %v805_v16  ;;  %v812_v5 = vsel %vm123_vm7, %v809_v48, 0.0 }
 0x60a   :  { %v1867_v29 = vpack.i.bf16 %v824_v21, %v823_v24  ;;  %v1857_v50 = vpack.i.bf16 %v789_v47, %v788_v32  ;;  %v806_v35 = vrot.slane %v789_v47, 7  ;;  %v818_v51 = vrot.slane %v789_v47, 1 }
 0x60b   :  { %v813_v17 = vsel %vm122_vm8, %v808_v49, 0.0 }
 0x60c   :  { %1868 = vrot.lane.b32.xlu1 %v1867_v29, %s2009_s21  ;;  %1858 = vrot.lane.b32.xlu0 %v1857_v50, %s2008_s20  ;;  %v819_v52 = vsel %vm132_vm3, %v817_v39, %v818_v51  ;;  %v822_v53 = vsel %vm132_vm3, %v818_v51, %v815_v37  ;;  %v810_v54 = vsel %vm109_vm2, %v806_v35, %v803_v36  ;;  %v2441_v36 = vld [vmem:[%s2678_s4 + $0x8] sm:$0x7] }
 0x60d   :  { %v825_v55 = vsel %vm145_vm4, %v819_v52, 0.0  ;;  %v826_v56 = vsel %vm146_vm5, %v822_v53, 0.0  ;;  %v807_v58 = vsel %vm109_vm2, %v805_v16, %v806_v35  ;;  %v811_v3 = vsel %vm122_vm8, %v810_v54, 0.0 }
 0x60e   :  { %v1872_v38 = vpack.i.bf16 %v826_v56, %v825_v55  ;;  %v814_v20 = vsel %vm123_vm7, %v807_v58, 0.0  ;;  %v872_v37 = vrot.slane %v2441_v36, %v2200_v23  ;;  %v1936_v55 = vld [vmem:[%s2677_s3 + $0x90] sm:$0xff]   ;;  %v1937_v56 = vld [vmem:[%s2677_s3 + $0x98] sm:$0xff]   ;;  %v1938_v58 = vld [vmem:[%s2677_s3 + $0xa0] sm:$0xff]  }
 0x60f   :  { %1742 = vmatprep.subr.bf16.mxu0 %v1936_v55 }
 0x610   :  { %1873 = vrot.lane.b32.xlu1 %v1872_v38, %s2009_s21  ;;  %1743 = vmatpush3.bf16.msra.mxu0 %v1936_v55 }
 0x611   :  { %1744 = vmatprep.subr.bf16.mxu0 %v1937_v56 }
 0x614   :  { %1745 = vmatpush3.bf16.msra.mxu0 %v1937_v56 }
 0x615   :  { %1746 = vmatprep.subr.bf16.mxu0 %v1938_v58 }
 0x618   :  { %1747 = vmatpush3.bf16.msra.mxu0 %v1938_v58 }
 0x67a   :  { %v1864_v60 = vpop.permute.xlu1 %1863 }
 0x67b   :  { %v1866_v62 = vunpack.i.h.bf16 %v1864_v60  ;;  %v1865_v63 = vunpack.i.l.bf16 %v1864_v60 }
 0x67d   :  { %v859_v9 = vsel %vm339_vm12, %v811_v3, %v1865_v63  ;;  %v860_v10 = vsel %vm339_vm12, %v812_v5, %v1866_v62 }
 0x67e   :  { %v1869_v0 = vpop.permute.xlu1 %1868  ;;  %v1859_v2 = vpop.permute.xlu0 %1858 }
 0x67f   :  { %v1871_v7 = vunpack.i.h.bf16 %v1869_v0  ;;  %v1870_v8 = vunpack.i.l.bf16 %v1869_v0  ;;  %v1861_v12 = vunpack.i.h.bf16 %v1859_v2  ;;  %v1860_v13 = vunpack.i.l.bf16 %v1859_v2 }
 0x681   :  { %v863_v61 = vsel %vm344_vm13, %v859_v9, %v1870_v8  ;;  %v864_v57 = vsel %vm344_vm13, %v860_v10, %v1871_v7  ;;  %v861_v18 = vsel %vm339_vm12, %v813_v17, %v1860_v13  ;;  %v862_v4 = vsel %vm339_vm12, %v814_v20, %v1861_v12 }
 0x682   :  { %v867_v15 = vpack.c.bf16 %v864_v57, %v863_v61  ;;  %v1874_v59 = vpop.permute.xlu1 %1873 }
 0x683   :  { %v1876_v1 = vunpack.i.h.bf16 %v1874_v59  ;;  %v1875_v27 = vunpack.i.l.bf16 %v1874_v59 }
 0x684   :  { %1738 = vmatprep.mubr.msk.bf16.mxu1 %vm391_vm14, %v867_v15 }
 0x685   :  { %v865_v32 = vsel %vm344_vm13, %v861_v18, %v1875_v27  ;;  %v866_v33 = vsel %vm344_vm13, %v862_v4, %v1876_v1 }
 0x686   :  { %v868_v34 = vpack.c.bf16 %v866_v33, %v865_v32 }
 0x688   :  { %1739 = vmatmul.mubr.msk.bf16.vlgmr.msra.gmra.mrb[4].mxu1 %vm391_vm14, %v868_v34 }
 0x75b   :  { %v1740_v39 = vpop.f32.mrb[4].mxu1 }
 0x75c   :  { %v2445_v16 = vadd.f32 %v1740_v39, %v872_v37  ;;  %v949_v40 = vpop.f32.mrb[5].mxu1  ;;  %v1027_v39 = vrot.slane %v2441_v36, %v2247_v19 }
 0x75d   :  { %v2447_v41 = vadd.f32 %v949_v40, %v872_v37  ;;  %v1741_v42 = vpop.f32.mrb[6].mxu1 }
 0x75e   :  { %v952_v26 = vpop.f32.mrb[7].mxu1  ;;  %v970_v45 = vsel %vm339_vm12, %v2445_v16, 0.0  ;;  %v2457_v24 = vadd.f32 %v1741_v42, %v872_v37  ;;  %v982_v29 = vmul.f32 %v2445_v16, %v2445_v16 }
 0x75f   :  { %v2451_v31 = vadd.f32 %v952_v26, %v872_v37  ;;  %971 = vadd.xlane.f32.xlu0 %v970_v45  ;;  %v980_v48 = vmul.f32 %v2447_v41, %v2447_v41  ;;  %v964_v21 = vsel %vm339_vm12, %v2447_v41, 0.0  ;;  %v1035_v26 = vrot.slane %v2441_v36, %v2250_v22 }
 0x760   :  { %v973_v50 = vsel %vm339_vm12, %v2457_v24, 0.0  ;;  %v990_v51 = vsel %vm339_vm12, %v982_v29, 0.0  ;;  %v983_v53 = vmul.f32 %v2457_v24, %v2457_v24 }
 0x761   :  { %v967_v47 = vsel %vm339_vm12, %v2451_v31, 0.0  ;;  %v984_v49 = vsel %vm339_vm12, %v980_v48, 0.0  ;;  %v981_v35 = vmul.f32 %v2451_v31, %v2451_v31 }
 0x762   :  { %968 = vadd.xlane.f32.xlu1 %v967_v47  ;;  %v993_v54 = vsel %vm339_vm12, %v983_v53, 0.0 }
 0x763   :  { %965 = vadd.xlane.f32.xlu0 %v964_v21  ;;  %v987_v52 = vsel %vm339_vm12, %v981_v35, 0.0 }
 0x766   :  { %985 = vadd.xlane.f32.xlu1 %v984_v49 }
 0x767   :  { %974 = vadd.xlane.f32.xlu0 %v973_v50 }
 0x76a   :  { %991 = vadd.xlane.f32.xlu1 %v990_v51  ;;  %v1939_v51 = vld [vmem:[%s2677_s3 + $0xa8] sm:$0xff]  }
 0x76b   :  { %988 = vadd.xlane.f32.xlu0 %v987_v52  ;;  %1748 = vmatprep.subr.bf16.mxu0 %v1939_v51 }
 0x76c   :  { %1749 = vmatpush3.bf16.msra.mxu0 %v1939_v51 }
 0x76f   :  { %994 = vadd.xlane.f32.xlu0 %v993_v54 }
 0x7ec   :  { %v972_v38 = vpop.xlane.xlu0 %971 }
 0x7ed   :  { %v978_v3 = vmul.f32 0.03125, %v972_v38 }
 0x7ef   :  { %v969_v60 = vpop.xlane.xlu1 %968  ;;  %v1002_v12 = vmul.f32 %v978_v3, %v978_v3  ;;  %v1010_v47 = vsub.f32 %v2445_v16, %v978_v3  ;;  %v1941_v3 = vld [vmem:[%s2677_s3 + $0xb8] sm:$0xff]  }
 0x7f0   :  { %v966_v62 = vpop.xlane.xlu0 %965  ;;  %v977_v8 = vmul.f32 0.03125, %v969_v60 }
 0x7f1   :  { %v976_v63 = vmul.f32 0.03125, %v966_v62 }
 0x7f2   :  { %v1001_v15 = vmul.f32 %v977_v8, %v977_v8  ;;  %v1009_v49 = vsub.f32 %v2451_v31, %v977_v8  ;;  %v1940_v31 = vld [vmem:[%s2677_s3 + $0xb0] sm:$0xff]  }
 0x7f3   :  { %v1000_v0 = vmul.f32 %v976_v63, %v976_v63  ;;  %v986_v2 = vpop.xlane.xlu1 %985  ;;  %v1008_v40 = vsub.f32 %v2447_v41, %v976_v63  ;;  %1750 = vmatprep.subr.bf16.mxu0 %v1940_v31 }
 0x7f4   :  { %v996_v5 = vmul.f32 0.03125, %v986_v2  ;;  %v975_v7 = vpop.xlane.xlu0 %974  ;;  %1751 = vmatpush3.bf16.msra.mxu0 %v1940_v31 }
 0x7f5   :  { %v979_v59 = vmul.f32 0.03125, %v975_v7  ;;  %1752 = vmatprep.subr.bf16.mxu0 %v1941_v3 }
 0x7f6   :  { %v1004_v9 = vsub.f32 %v996_v5, %v1000_v0 }
 0x7f7   :  { %v992_v10 = vpop.xlane.xlu1 %991  ;;  %v1003_v4 = vmul.f32 %v979_v59, %v979_v59  ;;  %v1011_v53 = vsub.f32 %v2457_v24, %v979_v59 }
 0x7f8   :  { %v1012_v13 = vadd.f32 1e-05, %v1004_v9  ;;  %v998_v61 = vmul.f32 0.03125, %v992_v10  ;;  %v989_v57 = vpop.xlane.xlu0 %988  ;;  %1753 = vmatpush3.bf16.msra.mxu0 %v1941_v3 }
 0x7f9   :  { %v997_v17 = vmul.f32 0.03125, %v989_v57 }
 0x7fa   :  { %1964 = vrsqrt.f32 %v1012_v13  ;;  %v1006_v20 = vsub.f32 %v998_v61, %v1002_v12 }
 0x7fb   :  { %v1005_v1 = vsub.f32 %v997_v17, %v1001_v15 }
 0x7fc   :  { %v1014_v27 = vadd.f32 1e-05, %v1006_v20  ;;  %v995_v18 = vpop.xlane.xlu0 %994 }
 0x7fd   :  { %v1013_v32 = vadd.f32 1e-05, %v1005_v1  ;;  %v999_v33 = vmul.f32 0.03125, %v995_v18 }
 0x7fe   :  { %1966 = vrsqrt.f32 %v1014_v27 }
 0x7ff   :  { %1968 = vrsqrt.f32 %v1013_v32  ;;  %v1007_v34 = vsub.f32 %v999_v33, %v1003_v4 }
 0x801   :  { %v1015_v37 = vadd.f32 1e-05, %v1007_v34 }
 0x803   :  { %1970 = vrsqrt.f32 %v1015_v37 }
 0x804   :  { %v1965_v42 = vpop.eup %1964 }
 0x805   :  { %v1020_v45 = vmul.f32 %v1965_v42, %v1008_v40 }
 0x807   :  { %v1028_v48 = vmul.f32 %v1027_v39, %v1020_v45 }
 0x808   :  { %v1967_v21 = vpop.eup %1966 }
 0x809   :  { %v1969_v29 = vpop.eup %1968  ;;  %v1022_v50 = vmul.f32 %v1967_v21, %v1010_v47  ;;  %v1036_v35 = vadd.f32 %v1035_v26, %v1028_v48 }
 0x80a   :  { %v1021_v41 = vmul.f32 %v1969_v29, %v1009_v49 }
 0x80b   :  { %v1030_v52 = vmul.f32 %v1027_v39, %v1022_v50  ;;  %v1042_v16 = vmax.f32 %v1036_v35, 0.0 }
 0x80c   :  { %v1029_v36 = vmul.f32 %v1027_v39, %v1021_v41 }
 0x80d   :  { %v1971_v54 = vpop.eup %1970  ;;  %v1038_v55 = vadd.f32 %v1035_v26, %v1030_v52  ;;  %v1059_v63 = vrot.slane %v1042_v16, 7  ;;  %v1071_v0 = vrot.slane %v1042_v16, 1 }
 0x80e   :  { %v1037_v56 = vadd.f32 %v1035_v26, %v1029_v36  ;;  %v1023_v58 = vmul.f32 %v1971_v54, %v1011_v53 }
 0x80f   :  { %v1044_v38 = vmax.f32 %v1038_v55, 0.0 }
 0x810   :  { %v1043_v60 = vmax.f32 %v1037_v56, 0.0  ;;  %v1031_v62 = vmul.f32 %v1027_v39, %v1023_v58 }
 0x811   :  { %v1073_v2 = vrot.slane %v1044_v38, 1  ;;  %v1061_v24 = vrot.slane %v1044_v38, 7 }
 0x812   :  { %v1882_v5 = vpack.i.bf16 %v1043_v60, %v1042_v16  ;;  %v1060_v7 = vrot.slane %v1043_v60, 7  ;;  %v1072_v8 = vrot.slane %v1043_v60, 1  ;;  %v1039_v9 = vadd.f32 %v1035_v26, %v1031_v62 }
 0x814   :  { %1883 = vrot.lane.b32.xlu1 %v1882_v5, %s2008_s20  ;;  %v1076_v10 = vsel %vm132_vm3, %v1072_v8, %v1073_v2  ;;  %v1077_v12 = vsel %vm132_vm3, %v1071_v0, %v1072_v8  ;;  %v1045_v13 = vmax.f32 %v1039_v9, 0.0  ;;  %v1065_v61 = vsel %vm109_vm2, %v1059_v63, %v1060_v7 }
 0x815   :  { %v1079_v57 = vsel %vm145_vm4, %v1077_v12, 0.0  ;;  %v1080_v15 = vsel %vm146_vm5, %v1076_v10, 0.0  ;;  %v1064_v59 = vsel %vm109_vm2, %v1060_v7, %v1061_v24  ;;  %v1068_v21 = vsel %vm123_vm7, %v1065_v61, 0.0 }
 0x816   :  { %v1887_v17 = vpack.i.bf16 %v1080_v15, %v1079_v57  ;;  %v1877_v20 = vpack.i.bf16 %v1045_v13, %v1044_v38  ;;  %v1062_v1 = vrot.slane %v1045_v13, 7  ;;  %v1074_v27 = vrot.slane %v1045_v13, 1 }
 0x817   :  { %v1069_v16 = vsel %vm122_vm8, %v1064_v59, 0.0 }
 0x818   :  { %1888 = vrot.lane.b32.xlu1 %v1887_v17, %s2009_s21  ;;  %1878 = vrot.lane.b32.xlu0 %v1877_v20, %s2008_s20  ;;  %v1075_v18 = vsel %vm132_vm3, %v1073_v2, %v1074_v27  ;;  %v1078_v4 = vsel %vm132_vm3, %v1074_v27, %v1071_v0  ;;  %v1066_v32 = vsel %vm109_vm2, %v1062_v1, %v1059_v63  ;;  %v2548_v0 = vld [vmem:[%s2678_s4 + $0xc] sm:$0x7] }
 0x819   :  { %v1081_v33 = vsel %vm145_vm4, %v1075_v18, 0.0  ;;  %v1082_v34 = vsel %vm146_vm5, %v1078_v4, 0.0  ;;  %v1063_v37 = vsel %vm109_vm2, %v1061_v24, %v1062_v1  ;;  %v1067_v48 = vsel %vm122_vm8, %v1066_v32, 0.0  ;;  %v1942_v32 = vld [vmem:[%s2679_s5] sm:$0xff]  }
 0x81a   :  { %v1892_v39 = vpack.i.bf16 %v1082_v34, %v1081_v33  ;;  %v1070_v55 = vsel %vm123_vm7, %v1063_v37, 0.0  ;;  %v1128_v2 = vrot.slane %v2548_v0, %v2200_v23  ;;  %v1943_v33 = vld [vmem:[%s2679_s5 + $0x8] sm:$0xff]   ;;  %1758 = vmatprep.subr.bf16.mxu1 %v1942_v32  ;;  %v1944_v34 = vld [vmem:[%s2679_s5 + $0x10] sm:$0xff]  }
 0x81b   :  { %1759 = vmatpush3.bf16.msra.mxu1 %v1942_v32 }
 0x81c   :  { %1893 = vrot.lane.b32.xlu1 %v1892_v39, %s2009_s21  ;;  %1760 = vmatprep.subr.bf16.mxu1 %v1943_v33 }
 0x81f   :  { %1761 = vmatpush3.bf16.msra.mxu1 %v1943_v33 }
 0x820   :  { %1762 = vmatprep.subr.bf16.mxu1 %v1944_v34 }
 0x823   :  { %1763 = vmatpush3.bf16.msra.mxu1 %v1944_v34 }
 0x886   :  { %v1884_v40 = vpop.permute.xlu1 %1883 }
 0x887   :  { %v1886_v42 = vunpack.i.h.bf16 %v1884_v40  ;;  %v1885_v26 = vunpack.i.l.bf16 %v1884_v40 }
 0x889   :  { %v1115_v50 = vsel %vm339_vm12, %v1067_v48, %v1885_v26  ;;  %v1116_v35 = vsel %vm339_vm12, %v1068_v21, %v1886_v42 }
 0x88a   :  { %v1889_v45 = vpop.permute.xlu1 %1888  ;;  %v1879_v47 = vpop.permute.xlu0 %1878 }
 0x88b   :  { %v1891_v49 = vunpack.i.h.bf16 %v1889_v45  ;;  %v1890_v29 = vunpack.i.l.bf16 %v1889_v45  ;;  %v1881_v51 = vunpack.i.h.bf16 %v1879_v47  ;;  %v1880_v41 = vunpack.i.l.bf16 %v1879_v47 }
 0x88d   :  { %v1119_v52 = vsel %vm344_vm13, %v1115_v50, %v1890_v29  ;;  %v1120_v53 = vsel %vm344_vm13, %v1116_v35, %v1891_v49  ;;  %v1117_v58 = vsel %vm339_vm12, %v1069_v16, %v1880_v41  ;;  %v1118_v38 = vsel %vm339_vm12, %v1070_v55, %v1881_v51 }
 0x88e   :  { %v1123_v36 = vpack.c.bf16 %v1120_v53, %v1119_v52  ;;  %v1894_v54 = vpop.permute.xlu1 %1893 }
 0x88f   :  { %v1896_v31 = vunpack.i.h.bf16 %v1894_v54  ;;  %v1895_v56 = vunpack.i.l.bf16 %v1894_v54 }
 0x890   :  { %1754 = vmatprep.mubr.msk.bf16.mxu0 %vm391_vm14, %v1123_v36 }
 0x891   :  { %v1121_v60 = vsel %vm344_vm13, %v1117_v58, %v1895_v56  ;;  %v1122_v62 = vsel %vm344_vm13, %v1118_v38, %v1896_v31 }
 0x892   :  { %v1124_v63 = vpack.c.bf16 %v1122_v62, %v1121_v60 }
 0x894   :  { %1755 = vmatmul.mubr.msk.bf16.vlgmr.msra.gmra.mrb[8].mxu0 %vm391_vm14, %v1124_v63 }
 0x967   :  { %v1756_v24 = vpop.f32.mrb[8].mxu0 }
 0x968   :  { %v2552_v3 = vadd.f32 %v1756_v24, %v1128_v2  ;;  %v1205_v5 = vpop.f32.mrb[9].mxu0 }
 0x969   :  { %v2554_v7 = vadd.f32 %v1205_v5, %v1128_v2  ;;  %v1757_v8 = vpop.f32.mrb[10].mxu0 }
 0x96a   :  { %v1208_v9 = vpop.f32.mrb[11].mxu0  ;;  %v1226_v10 = vsel %vm339_vm12, %v2552_v3, 0.0  ;;  %v2564_v61 = vadd.f32 %v1757_v8, %v1128_v2  ;;  %v1238_v59 = vmul.f32 %v2552_v3, %v2552_v3  ;;  %v1291_v8 = vrot.slane %v2548_v0, %v2250_v22 }
 0x96b   :  { %v2558_v12 = vadd.f32 %v1208_v9, %v1128_v2  ;;  %1227 = vadd.xlane.f32.xlu0 %v1226_v10  ;;  %v1236_v23 = vmul.f32 %v2554_v7, %v2554_v7  ;;  %v1220_v57 = vsel %vm339_vm12, %v2554_v7, 0.0  ;;  %v1283_v2 = vrot.slane %v2548_v0, %v2247_v19  ;;  %v1945_v19 = vld [vmem:[%s2679_s5 + $0x18] sm:$0xff]  }
 0x96c   :  { %v1229_v17 = vsel %vm339_vm12, %v2564_v61, 0.0  ;;  %v1246_v1 = vsel %vm339_vm12, %v1238_v59, 0.0  ;;  %v1239_v18 = vmul.f32 %v2564_v61, %v2564_v61  ;;  %1764 = vmatprep.subr.bf16.mxu1 %v1945_v19 }
 0x96d   :  { %v1223_v13 = vsel %vm339_vm12, %v2558_v12, 0.0  ;;  %v1240_v15 = vsel %vm339_vm12, %v1236_v23, 0.0  ;;  %v1237_v20 = vmul.f32 %v2558_v12, %v2558_v12  ;;  %1765 = vmatpush3.bf16.msra.mxu1 %v1945_v19 }
 0x96e   :  { %1224 = vadd.xlane.f32.xlu1 %v1223_v13  ;;  %v1249_v4 = vsel %vm339_vm12, %v1239_v18, 0.0 }
 0x96f   :  { %1221 = vadd.xlane.f32.xlu0 %v1220_v57  ;;  %v1243_v27 = vsel %vm339_vm12, %v1237_v20, 0.0 }
 0x972   :  { %1241 = vadd.xlane.f32.xlu1 %v1240_v15 }
 0x973   :  { %1230 = vadd.xlane.f32.xlu0 %v1229_v17 }
 0x976   :  { %1247 = vadd.xlane.f32.xlu1 %v1246_v1 }
 0x977   :  { %1244 = vadd.xlane.f32.xlu0 %v1243_v27 }
 0x97b   :  { %1250 = vadd.xlane.f32.xlu0 %v1249_v4 }
 0x9f8   :  { %v1228_v37 = vpop.xlane.xlu0 %1227 }
 0x9f9   :  { %v1234_v47 = vmul.f32 0.03125, %v1228_v37 }
 0x9fb   :  { %v1225_v39 = vpop.xlane.xlu1 %1224  ;;  %v1258_v35 = vmul.f32 %v1234_v47, %v1234_v47  ;;  %v1266_v10 = vsub.f32 %v2552_v3, %v1234_v47 }
 0x9fc   :  { %v1222_v40 = vpop.xlane.xlu0 %1221  ;;  %v1233_v49 = vmul.f32 0.03125, %v1225_v39 }
 0x9fd   :  { %v1232_v42 = vmul.f32 0.03125, %v1222_v40 }
 0x9fe   :  { %v1257_v53 = vmul.f32 %v1233_v49, %v1233_v49  ;;  %v1265_v57 = vsub.f32 %v2558_v12, %v1233_v49  ;;  %v1946_v12 = vld [vmem:[%s2679_s5 + $0x20] sm:$0xff]  }
 0x9ff   :  { %v1256_v26 = vmul.f32 %v1232_v42, %v1232_v42  ;;  %v1242_v45 = vpop.xlane.xlu1 %1241  ;;  %v1264_v24 = vsub.f32 %v2554_v7, %v1232_v42  ;;  %1766 = vmatprep.subr.bf16.mxu1 %v1946_v12 }
 0xa00   :  { %v1252_v48 = vmul.f32 0.03125, %v1242_v45  ;;  %v1231_v21 = vpop.xlane.xlu0 %1230  ;;  %1767 = vmatpush3.bf16.msra.mxu1 %v1946_v12 }
 0xa01   :  { %v1235_v36 = vmul.f32 0.03125, %v1231_v21 }
 0xa02   :  { %v1260_v29 = vsub.f32 %v1252_v48, %v1256_v26 }
 0xa03   :  { %v1248_v50 = vpop.xlane.xlu1 %1247  ;;  %v1259_v58 = vmul.f32 %v1235_v36, %v1235_v36  ;;  %v1267_v1 = vsub.f32 %v2564_v61, %v1235_v36 }
 0xa04   :  { %v1268_v51 = vadd.f32 1e-05, %v1260_v29  ;;  %v1254_v41 = vmul.f32 0.03125, %v1248_v50  ;;  %v1245_v52 = vpop.xlane.xlu0 %1244 }
 0xa05   :  { %v1253_v54 = vmul.f32 0.03125, %v1245_v52 }
 0xa06   :  { %1972 = vrsqrt.f32 %v1268_v51  ;;  %v1262_v16 = vsub.f32 %v1254_v41, %v1258_v35 }
 0xa07   :  { %v1261_v55 = vsub.f32 %v1253_v54, %v1257_v53 }
 0xa08   :  { %v1270_v31 = vadd.f32 1e-05, %v1262_v16  ;;  %v1251_v56 = vpop.xlane.xlu0 %1250 }
 0xa09   :  { %v1269_v38 = vadd.f32 1e-05, %v1261_v55  ;;  %v1255_v60 = vmul.f32 0.03125, %v1251_v56 }
 0xa0a   :  { %1974 = vrsqrt.f32 %v1270_v31 }
 0xa0b   :  { %1976 = vrsqrt.f32 %v1269_v38  ;;  %v1263_v62 = vsub.f32 %v1255_v60, %v1259_v58 }
 0xa0d   :  { %v1271_v63 = vadd.f32 1e-05, %v1263_v62 }
 0xa0f   :  { %1978 = vrsqrt.f32 %v1271_v63 }
 0xa10   :  { %v1973_v5 = vpop.eup %1972 }
 0xa11   :  { %v1276_v9 = vmul.f32 %v1973_v5, %v1264_v24 }
 0xa13   :  { %v1284_v13 = vmul.f32 %v1283_v2, %v1276_v9 }
 0xa14   :  { %v1975_v23 = vpop.eup %1974 }
 0xa15   :  { %v1977_v15 = vpop.eup %1976  ;;  %v1278_v59 = vmul.f32 %v1975_v23, %v1266_v10  ;;  %v1292_v17 = vadd.f32 %v1291_v8, %v1284_v13 }
 0xa16   :  { %v1277_v7 = vmul.f32 %v1977_v15, %v1265_v57 }
 0xa17   :  { %v1286_v20 = vmul.f32 %v1283_v2, %v1278_v59  ;;  %v1296_v3 = vadd.f32 %v1292_v17, %v2367_v14  ;;  %v1947_v14 = vld [vmem:[%s2679_s5 + $0x28] sm:$0xff]  }
 0xa18   :  { %v1285_v22 = vmul.f32 %v1283_v2, %v1277_v7  ;;  %1768 = vmatprep.subr.bf16.mxu1 %v1947_v14 }
 0xa19   :  { %v1979_v0 = vpop.eup %1978  ;;  %v1294_v27 = vadd.f32 %v1291_v8, %v1286_v20  ;;  %v1313_v61 = vrot.slane %v1296_v3, 7  ;;  %v1325_v37 = vrot.slane %v1296_v3, 1  ;;  %1769 = vmatpush3.bf16.msra.mxu1 %v1947_v14 }
 0xa1a   :  { %v1293_v18 = vadd.f32 %v1291_v8, %v1285_v22  ;;  %v1279_v4 = vmul.f32 %v1979_v0, %v1267_v1 }
 0xa1b   :  { %v1298_v32 = vadd.f32 %v1294_v27, %v2375_v28 }
 0xa1c   :  { %v1297_v33 = vadd.f32 %v1293_v18, %v2381_v30  ;;  %v1287_v34 = vmul.f32 %v1283_v2, %v1279_v4 }
 0xa1d   :  { %v1327_v39 = vrot.slane %v1298_v32, 1  ;;  %v1315_v40 = vrot.slane %v1298_v32, 7 }
 0xa1e   :  { %v1902_v42 = vpack.i.bf16 %v1297_v33, %v1296_v3  ;;  %v1314_v26 = vrot.slane %v1297_v33, 7  ;;  %v1326_v45 = vrot.slane %v1297_v33, 1  ;;  %v1295_v47 = vadd.f32 %v1291_v8, %v1287_v34 }
 0xa20   :  { %1903 = vrot.lane.b32.xlu1 %v1902_v42, %s2008_s20  ;;  %v1330_v28 = vsel %vm132_vm3, %v1326_v45, %v1327_v39  ;;  %v1331_v30 = vsel %vm132_vm3, %v1325_v37, %v1326_v45  ;;  %v1299_v48 = vadd.f32 %v1295_v47, %v2389_v43  ;;  %v1319_v21 = vsel %vm109_vm2, %v1313_v61, %v1314_v26 }
 0xa21   :  { %v1333_v49 = vsel %vm145_vm4, %v1331_v30, 0.0  ;;  %v1334_v29 = vsel %vm146_vm5, %v1330_v28, 0.0  ;;  %v1318_v50 = vsel %vm109_vm2, %v1314_v26, %v1315_v40  ;;  %v1322_v11 = vsel %vm123_vm7, %v1319_v21, 0.0 }
 0xa22   :  { %v1907_v35 = vpack.i.bf16 %v1334_v29, %v1333_v49  ;;  %v1897_v51 = vpack.i.bf16 %v1299_v48, %v1298_v32  ;;  %v1316_v41 = vrot.slane %v1299_v48, 7  ;;  %v1328_v52 = vrot.slane %v1299_v48, 1 }
 0xa23   :  { %v1323_v57 = vsel %vm122_vm8, %v1318_v50, 0.0 }
 0xa24   :  { %1908 = vrot.lane.b32.xlu1 %v1907_v35, %s2009_s21  ;;  %1898 = vrot.lane.b32.xlu0 %v1897_v51, %s2008_s20  ;;  %v1329_v43 = vsel %vm132_vm3, %v1327_v39, %v1328_v52  ;;  %v1332_v53 = vsel %vm132_vm3, %v1328_v52, %v1325_v37  ;;  %v1320_v36 = vsel %vm109_vm2, %v1316_v41, %v1313_v61 }
 0xa25   :  { %v1335_v54 = vsel %vm145_vm4, %v1329_v43, 0.0  ;;  %v1336_v16 = vsel %vm146_vm5, %v1332_v53, 0.0  ;;  %v1317_v55 = vsel %vm109_vm2, %v1315_v40, %v1316_v41  ;;  %v1321_v63 = vsel %vm122_vm8, %v1320_v36, 0.0 }
 0xa26   :  { %v1912_v31 = vpack.i.bf16 %v1336_v16, %v1335_v54  ;;  %v1324_v15 = vsel %vm123_vm7, %v1317_v55, 0.0 }
 0xa28   :  { %1913 = vrot.lane.b32.xlu1 %v1912_v31, %s2009_s21 }
 0xa92   :  { %v1904_v56 = vpop.permute.xlu1 %1903 }
 0xa93   :  { %v1906_v58 = vunpack.i.h.bf16 %v1904_v56  ;;  %v1905_v38 = vunpack.i.l.bf16 %v1904_v56 }
 0xa95   :  { %v1369_v24 = vsel %vm339_vm12, %v1321_v63, %v1905_v38  ;;  %v1370_v6 = vsel %vm339_vm12, %v1322_v11, %v1906_v58 }
 0xa96   :  { %v1909_v60 = vpop.permute.xlu1 %1908  ;;  %v1899_v62 = vpop.permute.xlu0 %1898 }
 0xa97   :  { %v1911_v2 = vunpack.i.h.bf16 %v1909_v60  ;;  %v1910_v25 = vunpack.i.l.bf16 %v1909_v60  ;;  %v1901_v5 = vunpack.i.h.bf16 %v1899_v62  ;;  %v1900_v8 = vunpack.i.l.bf16 %v1899_v62 }
 0xa99   :  { %v1373_v9 = vsel %vm344_vm13, %v1369_v24, %v1910_v25  ;;  %v1374_v10 = vsel %vm344_vm13, %v1370_v6, %v1911_v2  ;;  %v1371_v19 = vsel %vm339_vm12, %v1323_v57, %v1900_v8  ;;  %v1372_v7 = vsel %vm339_vm12, %v1324_v15, %v1901_v5 }
 0xa9a   :  { %v1377_v13 = vpack.c.bf16 %v1374_v10, %v1373_v9  ;;  %v1914_v23 = vpop.permute.xlu1 %1913 }
 0xa9b   :  { %v1916_v59 = vunpack.i.h.bf16 %v1914_v23  ;;  %v1915_v17 = vunpack.i.l.bf16 %v1914_v23 }
 0xa9c   :  { %1770 = vmatprep.mubr.msk.bf16.mxu1 %vm391_vm14, %v1377_v13 }
 0xa9d   :  { %v1375_v20 = vsel %vm344_vm13, %v1371_v19, %v1915_v17  ;;  %v1376_v1 = vsel %vm344_vm13, %v1372_v7, %v1916_v59 }
 0xa9e   :  { %v1378_v22 = vpack.c.bf16 %v1376_v1, %v1375_v20 }
 0xaa0   :  { %1771 = vmatmul.mubr.msk.bf16.vlgmr.msra.gmra.mrb[8].mxu1 %vm391_vm14, %v1378_v22 }
 0xb73   :  { %v1772_v46 = vpop.f32.mrb[8].mxu1 }
 0xb74   :  { %v1470_v0 = vadd.f32 %v1772_v46, %v1636_v44  ;;  %v1461_v3 = vpop.f32.mrb[9].mxu1 }
 0xb75   :  { %v1462_v27 = vadd.f32 %v1636_v44, %v1461_v3  ;;  %v1773_v12 = vpop.f32.mrb[10].mxu1 }
 0xb76   :  { %1510 = vxpose.xlu1.b32.start [1/2] (short) (narrow) %v1470_v0, 8  ;;  %v1464_v18 = vpop.f32.mrb[11].mxu1  ;;  %v1473_v4 = vadd.f32 %v1773_v12, %v1636_v44 }
 0xb77   :  { %1476 = vxpose.xlu0.b32.start [1/2] (short) (narrow) %v1462_v27, 8  ;;  %v1465_v32 = vadd.f32 %v1636_v44, %v1464_v18 }
 0xb7a   :  { %1511 = vxpose.xlu1.b32.end [2/2] (short) (narrow) %v1473_v4, 8 }
 0xb7b   :  { %1477 = vxpose.xlu0.b32.end [2/2] (short) (narrow) %v1465_v32, 8 }
 0xbf6   :  { %v1526_v33 = vpop.trf.xlu1 }
 0xbf7   :  { %1543 = vst.msk [vmem:[#allocation2 + $0x4] sm:$0xf] %vm1508_vm15, %v1526_v33  ;;  %v1492_v34 = vpop.trf.xlu0 }
 0xbf8   :  { %1509 = vst.msk [vmem:[#allocation2] sm:$0xf] %vm1508_vm15, %v1492_v34 }
 0xbf9   :  { %1991 = shalt.err (!%p1988_p4)
}
 0xbfa   :  { %s1992_s10 = scalar_lea.hbm %s2681_s7, 128 }
 0xbfb   :  { %p1993_p5 = scmp.ne.s32.totalorder %s2681_s7, %s1992_s10  ;;  %p1996_p6 = scmp.lt.u32.totalorder %s1992_s10, %s2681_s7 }
 0xbfd   :  { %p1998_p7 = pnand %p1996_p6, %p1993_p5 }
 0xbff   :  { %2001 = shalt.err (!%p1998_p7)
}
 0xc00   :  { %1555 = dma.vmem_to_hbm [thread:$0]  %s1550_s30, 128, %s2681_s7, [#allocation3], %s2009_s21, %s2009_s21, %s2006_s29  }
 0xc01   :  { %2002 = dma.done.wait [#allocation3], 128  }
 0xc02   :  { %2003 = vsyncadd [#allocation3], 4294967168 }
 0xc03   :  { %1559 = vsyncpa [#allocation3], 1 }

</bundles_post_ra>
